<compile_context>
chip_gen: v7x
topology: tpu7x:2x2x1
jax: 0.10.0
libtpu: 0.0.40
codegen_flags: <defaults>
</compile_context>

<pallas_src>
import jax
import jax.numpy as jnp
from jax.experimental import pallas as pl
from jax.experimental.pallas import tpu as pltpu


def _build_kernel(B, T, In, H, num_layers):
    G = 4 * H

    def kernel(*refs):
        x_ref, wbig_ref, bbig_ref, whh0_ref = refs[0], refs[1], refs[2], refs[3]
        idx = 4
        upper = []
        for _ in range(num_layers - 1):
            upper.append((refs[idx], refs[idx + 1], refs[idx + 2]))
            idx += 3
        wfc_ref, bfc_ref, out_ref = refs[idx], refs[idx + 1], refs[idx + 2]

        # ---- fused img_projector + layer-0 input matmul: ONE K=2048 pass ----
        # wbig has its REAL width 4H+H (no zero lanes); x is cast to bf16 here.
        # cols [0:4H)   = layer-0 input pre-activations (bias b0 folded in)
        # cols [4H:5H)  = img_projector(x) features      (bias bp folded in)
        x_bf16 = x_ref[...].astype(jnp.bfloat16)
        big = jnp.dot(x_bf16, wbig_ref[...],
                      preferred_element_type=jnp.float32) + bbig_ref[...]
        gin0 = big[:, :G].reshape(B, T, G)     # row order of big is b*T + t
        feat = big[:, G:G + H]                 # (B*T, H) img_projector(x), f32

        def step(pre, h_l, c_l, whh_bf16):
            # Recurrent dot is the only matmul on the serial chain: bf16
            # operands, f32 accumulate (single MXU pass on every generation);
            # all elementwise gate/state math stays f32 (v5e-safe).
            gates = pre + jnp.dot(h_l.astype(jnp.bfloat16), whh_bf16,
                                  preferred_element_type=jnp.float32)
            # Two full-width (B, 4H) EUP passes instead of four sliced ones.
            sg = jax.nn.sigmoid(gates)
            th = jnp.tanh(gates)
            i_g = sg[:, 0:H]
            f_g = sg[:, H:2 * H]
            g_g = th[:, 2 * H:3 * H]
            o_g = sg[:, 3 * H:4 * H]
            c_n = f_g * c_l + i_g * g_g
            h_n = o_g * jnp.tanh(c_n)
            return h_n, c_n

        # ---- layer 0: only the recurrent matmul remains on the serial path ----
        h_l = feat[0:T, :]          # h0[0] = c0[0] = img_projector(x)[0]  (T == B)
        c_l = h_l
        whh0 = whh0_ref[...]
        seq = []
        for t in range(T):
            h_l, c_l = step(gin0[:, t, :], h_l, c_l, whh0)
            seq.append(h_l)

        # ---- layers >= 1: hoist + batch the input matmul over all timesteps ----
        for l in range(1, num_layers):
            wih_ref, whh_ref, b_ref = upper[l - 1]
            xin = jnp.concatenate(seq, axis=0).astype(jnp.bfloat16)  # (T*B, H)
            gin = (jnp.dot(xin, wih_ref[...],
                           preferred_element_type=jnp.float32) + b_ref[...])
            whh = whh_ref[...]
            h_l = feat[l * T:(l + 1) * T, :]
            c_l = h_l
            seq = []
            for t in range(T):
                h_l, c_l = step(gin[t * B:(t + 1) * B, :], h_l, c_l, whh)
                seq.append(h_l)

        # ---- fc on the last timestep; 128-lane padded output (unmasked store) ----
        logits = (jnp.dot(seq[T - 1].astype(jnp.bfloat16), wfc_ref[...],
                          preferred_element_type=jnp.float32) + bfc_ref[...])
        out_ref[...] = logits

    return kernel


def pack_params(params, num_layers, hidden_size, output_size):
    """Host-side one-time packing: fuse/pad/cast the weights for the kernel."""
    H = hidden_size
    G = 4 * H
    In = params["wp"].shape[0]
    n_big = G + H                      # REAL width (160): no zero-padded lanes
    o_pad = max(128, ((output_size + 127) // 128) * 128)

    wbig = jnp.zeros((In, n_big), jnp.float32)
    wbig = wbig.at[:, :G].set(params["wih0"])
    wbig = wbig.at[:, G:G + H].set(params["wp"])
    wbig = wbig.astype(jnp.bfloat16)              # halve the dominant weight DMA
    bbig = jnp.zeros((1, n_big), jnp.float32)
    bbig = bbig.at[:, :G].set(params["b0"]).at[:, G:G + H].set(params["bp"])

    wfc = jnp.zeros((H, o_pad), jnp.float32).at[:, :output_size].set(params["wfc"])
    wfc = wfc.astype(jnp.bfloat16)
    bfc = jnp.zeros((1, o_pad), jnp.float32).at[:, :output_size].set(params["bfc"])

    packed = {"wbig": wbig, "bbig": bbig,
              "whh0": params["whh0"].astype(jnp.bfloat16),
              "wfc": wfc, "bfc": bfc, "n_big": n_big, "o_pad": o_pad}
    for l in range(1, num_layers):
        packed[f"wih{l}"] = params[f"wih{l}"].astype(jnp.bfloat16)
        packed[f"whh{l}"] = params[f"whh{l}"].astype(jnp.bfloat16)
        packed[f"b{l}"] = params[f"b{l}"]
    return packed


def lstm_decoder_forward(x, packed, num_layers, hidden_size, output_size):
    """Returns the lane-dense padded (B, o_pad) logits block; the module's
    logits are the first `output_size` lanes (slice downstream, or consume
    padded)."""
    B, T, In = x.shape
    H = hidden_size
    assert B == T == num_layers, (
        "PyTorch module only runs when batch == seq_len == num_layers")
    n_big, o_pad = packed["n_big"], packed["o_pad"]
    G = 4 * H

    # (b, t)-ordered rows; kept f32 -- the bf16 cast happens inside the kernel.
    x2d = x.reshape(B * T, In)

    args = [x2d, packed["wbig"], packed["bbig"], packed["whh0"]]
    for l in range(1, num_layers):
        args += [packed[f"wih{l}"], packed[f"whh{l}"], packed[f"b{l}"]]
    args += [packed["wfc"], packed["bfc"]]

    flops = (2 * (B * T) * In * n_big                      # fused projector + wih0
             + 2 * (num_layers - 1) * (B * T) * H * G      # hoisted upper-layer inputs
             + 2 * num_layers * T * B * H * G              # recurrent matmuls
             + 2 * B * H * o_pad)                          # fc
    transcendentals = num_layers * T * (2 * B * G + B * H)
    bytes_accessed = sum(int(a.size) * a.dtype.itemsize for a in args) + B * o_pad * 4

    kernel = _build_kernel(B, T, In, H, num_layers)
    # Single grid point: all operands resident in VMEM (footprint ~0.8 MB),
    # no K-tiling / extra pipelining (per-step grid overhead would exceed the
    # hidden compute at these shapes).
    # TODO(synk): in an autoregressive decode loop, make the ~0.65 MB of static
    # weights cross-call resident (P10: a prior pallas_call starts the weight
    # DMAs into persistent VMEM and returns SEMAPHORE+VMEM outputs consumed
    # here, has_side_effects=True) instead of re-DMAing them every invocation;
    # not exercisable in this single-invocation script.
    # TODO(synk): when serving many independent decoder invocations on v7x,
    # batch them into one pallas_call with a leading "parallel" grid axis so
    # Mosaic shards across the 2 TensorCores and amortizes launch overhead.
    out_pad = pl.pallas_call(
        kernel,
        out_shape=jax.ShapeDtypeStruct((B, o_pad), jnp.float32),
        in_specs=[pl.BlockSpec(memory_space=pltpu.MemorySpace.VMEM)] * len(args),
        out_specs=pl.BlockSpec(memory_space=pltpu.MemorySpace.VMEM),
        cost_estimate=pl.CostEstimate(flops=int(flops),
                                      transcendentals=int(transcendentals),
                                      bytes_accessed=int(bytes_accessed)),
    )(*args)
    return out_pad


def lstm_decoder_reference(x, params, num_layers, mirror_bf16=False):
    """Pure-JAX reference mirroring the PyTorch forward semantics.

    mirror_bf16=True mirrors the kernel's quantization points exactly (bf16 x,
    bf16 weights, bf16 LHS at every dot, f32 accumulation and f32 elementwise
    state), so the kernel can be checked against it with tight tolerances.
    """
    B, T, In = x.shape
    H = params["wp"].shape[1]

    def q(a):
        return a.astype(jnp.bfloat16).astype(jnp.float32) if mirror_bf16 else a

    x2 = q(x)
    feat = (x2.reshape(B * T, In) @ q(params["wp"]) + params["bp"]).reshape(B, T, H)
    h = [feat[l] for l in range(num_layers)]
    c = [feat[l] for l in range(num_layers)]
    seq = [x2[:, t, :] for t in range(T)]
    for l in range(num_layers):
        wih = q(params[f"wih{l}"])
        whh = q(params[f"whh{l}"])
        b = params[f"b{l}"]
        h_l, c_l = h[l], c[l]
        outs = []
        for t in range(T):
            inp = seq[t] if l == 0 else q(seq[t])    # layer-0 input is already q(x)
            g = inp @ wih + q(h_l) @ whh + b
            i_g = jax.nn.sigmoid(g[:, :H])
            f_g = jax.nn.sigmoid(g[:, H:2 * H])
            g_g = jnp.tanh(g[:, 2 * H:3 * H])
            o_g = jax.nn.sigmoid(g[:, 3 * H:])
            c_l = f_g * c_l + i_g * g_g
            h_l = o_g * jnp.tanh(c_l)
            outs.append(h_l)
        seq = outs
    return q(seq[T - 1]) @ q(params["wfc"]) + params["bfc"]


def init_params(key, input_size, hidden_size, output_size, num_layers):
    H = hidden_size
    ks = jax.random.split(key, 4 + 4 * num_layers)

    def u(k, shape, fan_in):
        bound = 1.0 / jnp.sqrt(jnp.float32(fan_in))
        return jax.random.uniform(k, shape, jnp.float32, -bound, bound)

    p = {}
    p["wp"] = u(ks[0], (2048, H), 2048)          # img_projector weight^T
    p["bp"] = u(ks[1], (1, H), 2048)
    idx = 2
    for l in range(num_layers):
        in_l = input_size if l == 0 else H
        p[f"wih{l}"] = u(ks[idx], (in_l, 4 * H), H); idx += 1
        p[f"whh{l}"] = u(ks[idx], (H, 4 * H), H); idx += 1
        b_ih = u(ks[idx], (1, 4 * H), H); idx += 1
        b_hh = u(ks[idx], (1, 4 * H), H); idx += 1
        p[f"b{l}"] = b_ih + b_hh                 # PyTorch adds b_ih + b_hh
    p["wfc"] = u(ks[idx], (H, output_size), H); idx += 1
    p["bfc"] = u(ks[idx], (1, output_size), H)
    return p


if __name__ == "__main__":
    input_size = 2048      # fixed by nn.Linear(2048, hidden) applied to x
    hidden_size = 32
    output_size = 10
    num_layers = 2
    B = T = num_layers     # required by the original module's h0 = img_projector(x)

    key = jax.random.PRNGKey(0)
    kx, kf, kp = jax.random.split(key, 3)
    x = jax.random.normal(kx, (B, T, input_size), jnp.float32)
    features = jax.random.normal(kf, (B, 3, 8, 8), jnp.float32)  # unused
    # TODO(synk): encoder(features) is immediately overwritten in the PyTorch
    # forward; it never affects the output, so it is not implemented.

    params = init_params(kp, input_size, hidden_size, output_size, num_layers)
    packed = pack_params(params, num_layers, hidden_size, output_size)

    out_pad = lstm_decoder_forward(x, packed, num_layers, hidden_size, output_size)
    out_pad = jax.block_until_ready(out_pad)
    assert out_pad.shape == (B, packed["o_pad"])
    out = out_pad[:, :output_size]               # module logits = first 10 lanes

    # Tight check against a reference that mirrors the kernel's bf16 feed of x
    # and of all weights (accumulation and elementwise state stay f32).
    ref_q = lstm_decoder_reference(x, params, num_layers, mirror_bf16=True)
    # Loose sanity check against the pure-f32 module semantics (bf16
    # quantization of the weights perturbs logits by O(1e-2)).
    ref_f = lstm_decoder_reference(x, params, num_layers, mirror_bf16=False)

    assert out.shape == (B, output_size)
    assert jnp.allclose(out, ref_q, rtol=5e-3, atol=5e-3)
    assert jnp.allclose(out, ref_f, rtol=1e-1, atol=1e-1)
    print("KERNEL_OK")
</pallas_src>

<mosaic_0001>
module attributes {stable_mosaic.version = 11 : i64} {
  func.func @kernel(%arg0: memref<4x2048xf32, #tpu.memory_space<vmem>>, %arg1: memref<2048x160xbf16, #tpu.memory_space<vmem>>, %arg2: memref<1x160xf32, #tpu.memory_space<vmem>>, %arg3: memref<32x128xbf16, #tpu.memory_space<vmem>>, %arg4: memref<32x128xbf16, #tpu.memory_space<vmem>>, %arg5: memref<32x128xbf16, #tpu.memory_space<vmem>>, %arg6: memref<1x128xf32, #tpu.memory_space<vmem>>, %arg7: memref<32x128xbf16, #tpu.memory_space<vmem>>, %arg8: memref<1x128xf32, #tpu.memory_space<vmem>>, %arg9: memref<2x128xf32, #tpu.memory_space<vmem>>) attributes {dimension_semantics = [], scalar_prefetch = 0 : i64, scratch_operands = 0 : i64, tpu.core_type = #tpu.core_type<tc>} {
    %c0 = arith.constant 0 : index
    %c0_0 = arith.constant 0 : index
    %0 = vector.load %arg0[%c0, %c0_0] : memref<4x2048xf32, #tpu.memory_space<vmem>>, vector<4x2048xf32>
    %1 = arith.truncf %0 : vector<4x2048xf32> to vector<4x2048xbf16>
    %c0_1 = arith.constant 0 : index
    %c0_2 = arith.constant 0 : index
    %2 = vector.load %arg1[%c0_1, %c0_2] : memref<2048x160xbf16, #tpu.memory_space<vmem>>, vector<2048x160xbf16>
    %cst = arith.constant dense<0.000000e+00> : vector<4x160xf32>
    %3 = tpu.matmul %1, %2, %cst {dimension_numbers = #tpu.dot_dimension_numbers<[1], [0], [0], [1], [0, 0, 1, 1], [], []>} : vector<4x2048xbf16>, vector<2048x160xbf16>, vector<4x160xf32> -> vector<4x160xf32>
    %c0_3 = arith.constant 0 : index
    %c0_4 = arith.constant 0 : index
    %4 = vector.load %arg2[%c0_3, %c0_4] : memref<1x160xf32, #tpu.memory_space<vmem>>, vector<1x160xf32>
    %5 = vector.broadcast %4 : vector<1x160xf32> to vector<4x160xf32>
    %6 = arith.addf %3, %5 : vector<4x160xf32>
    %7 = vector.extract_strided_slice %6 {offsets = [0, 0], sizes = [4, 128], strides = [1, 1]} : vector<4x160xf32> to vector<4x128xf32>
    %8 = vector.shape_cast %7 : vector<4x128xf32> to vector<2x2x128xf32>
    %9 = vector.extract_strided_slice %6 {offsets = [0, 128], sizes = [4, 32], strides = [1, 1]} : vector<4x160xf32> to vector<4x32xf32>
    %10 = vector.extract_strided_slice %9 {offsets = [0, 0], sizes = [2, 32], strides = [1, 1]} : vector<4x32xf32> to vector<2x32xf32>
    %c0_5 = arith.constant 0 : index
    %c0_6 = arith.constant 0 : index
    %11 = vector.load %arg3[%c0_5, %c0_6] : memref<32x128xbf16, #tpu.memory_space<vmem>>, vector<32x128xbf16>
    %12 = vector.extract_strided_slice %8 {offsets = [0, 0, 0], sizes = [2, 1, 128], strides = [1, 1, 1]} : vector<2x2x128xf32> to vector<2x1x128xf32>
    %13 = vector.shape_cast %12 : vector<2x1x128xf32> to vector<2x128xf32>
    %14 = arith.truncf %10 : vector<2x32xf32> to vector<2x32xbf16>
    %cst_7 = arith.constant dense<0.000000e+00> : vector<2x128xf32>
    %15 = tpu.matmul %14, %11, %cst_7 {dimension_numbers = #tpu.dot_dimension_numbers<[1], [0], [0], [1], [0, 0, 1, 1], [], []>} : vector<2x32xbf16>, vector<32x128xbf16>, vector<2x128xf32> -> vector<2x128xf32>
    %16 = arith.addf %13, %15 : vector<2x128xf32>
    %17 = arith.negf %16 : vector<2x128xf32>
    %18 = math.exp %17 : vector<2x128xf32>
    %cst_8 = arith.constant 1.000000e+00 : f32
    %19 = vector.broadcast %cst_8 : f32 to vector<2x128xf32>
    %20 = arith.addf %19, %18 : vector<2x128xf32>
    %21 = arith.divf %19, %20 : vector<2x128xf32>
    %22 = math.tanh %16 : vector<2x128xf32>
    %23 = vector.extract_strided_slice %21 {offsets = [0, 0], sizes = [2, 32], strides = [1, 1]} : vector<2x128xf32> to vector<2x32xf32>
    %24 = vector.extract_strided_slice %21 {offsets = [0, 32], sizes = [2, 32], strides = [1, 1]} : vector<2x128xf32> to vector<2x32xf32>
    %25 = vector.extract_strided_slice %22 {offsets = [0, 64], sizes = [2, 32], strides = [1, 1]} : vector<2x128xf32> to vector<2x32xf32>
    %26 = vector.extract_strided_slice %21 {offsets = [0, 96], sizes = [2, 32], strides = [1, 1]} : vector<2x128xf32> to vector<2x32xf32>
    %27 = arith.mulf %24, %10 : vector<2x32xf32>
    %28 = arith.mulf %23, %25 : vector<2x32xf32>
    %29 = arith.addf %27, %28 : vector<2x32xf32>
    %30 = math.tanh %29 : vector<2x32xf32>
    %31 = arith.mulf %26, %30 : vector<2x32xf32>
    %32 = vector.extract_strided_slice %8 {offsets = [0, 1, 0], sizes = [2, 1, 128], strides = [1, 1, 1]} : vector<2x2x128xf32> to vector<2x1x128xf32>
    %33 = vector.shape_cast %32 : vector<2x1x128xf32> to vector<2x128xf32>
    %34 = arith.truncf %31 : vector<2x32xf32> to vector<2x32xbf16>
    %cst_9 = arith.constant dense<0.000000e+00> : vector<2x128xf32>
    %35 = tpu.matmul %34, %11, %cst_9 {dimension_numbers = #tpu.dot_dimension_numbers<[1], [0], [0], [1], [0, 0, 1, 1], [], []>} : vector<2x32xbf16>, vector<32x128xbf16>, vector<2x128xf32> -> vector<2x128xf32>
    %36 = arith.addf %33, %35 : vector<2x128xf32>
    %37 = arith.negf %36 : vector<2x128xf32>
    %38 = math.exp %37 : vector<2x128xf32>
    %cst_10 = arith.constant 1.000000e+00 : f32
    %39 = vector.broadcast %cst_10 : f32 to vector<2x128xf32>
    %40 = arith.addf %39, %38 : vector<2x128xf32>
    %41 = arith.divf %39, %40 : vector<2x128xf32>
    %42 = math.tanh %36 : vector<2x128xf32>
    %43 = vector.extract_strided_slice %41 {offsets = [0, 0], sizes = [2, 32], strides = [1, 1]} : vector<2x128xf32> to vector<2x32xf32>
    %44 = vector.extract_strided_slice %41 {offsets = [0, 32], sizes = [2, 32], strides = [1, 1]} : vector<2x128xf32> to vector<2x32xf32>
    %45 = vector.extract_strided_slice %42 {offsets = [0, 64], sizes = [2, 32], strides = [1, 1]} : vector<2x128xf32> to vector<2x32xf32>
    %46 = vector.extract_strided_slice %41 {offsets = [0, 96], sizes = [2, 32], strides = [1, 1]} : vector<2x128xf32> to vector<2x32xf32>
    %47 = arith.mulf %44, %29 : vector<2x32xf32>
    %48 = arith.mulf %43, %45 : vector<2x32xf32>
    %49 = arith.addf %47, %48 : vector<2x32xf32>
    %50 = math.tanh %49 : vector<2x32xf32>
    %51 = arith.mulf %46, %50 : vector<2x32xf32>
    %52 = tpu.concatenate %31, %51 in 0 : vector<2x32xf32>, vector<2x32xf32> -> vector<4x32xf32>
    %53 = arith.truncf %52 : vector<4x32xf32> to vector<4x32xbf16>
    %c0_11 = arith.constant 0 : index
    %c0_12 = arith.constant 0 : index
    %54 = vector.load %arg4[%c0_11, %c0_12] : memref<32x128xbf16, #tpu.memory_space<vmem>>, vector<32x128xbf16>
    %cst_13 = arith.constant dense<0.000000e+00> : vector<4x128xf32>
    %55 = tpu.matmul %53, %54, %cst_13 {dimension_numbers = #tpu.dot_dimension_numbers<[1], [0], [0], [1], [0, 0, 1, 1], [], []>} : vector<4x32xbf16>, vector<32x128xbf16>, vector<4x128xf32> -> vector<4x128xf32>
    %c0_14 = arith.constant 0 : index
    %c0_15 = arith.constant 0 : index
    %56 = vector.load %arg6[%c0_14, %c0_15] : memref<1x128xf32, #tpu.memory_space<vmem>>, vector<1x128xf32>
    %57 = vector.broadcast %56 : vector<1x128xf32> to vector<4x128xf32>
    %58 = arith.addf %55, %57 : vector<4x128xf32>
    %c0_16 = arith.constant 0 : index
    %c0_17 = arith.constant 0 : index
    %59 = vector.load %arg5[%c0_16, %c0_17] : memref<32x128xbf16, #tpu.memory_space<vmem>>, vector<32x128xbf16>
    %60 = vector.extract_strided_slice %9 {offsets = [2, 0], sizes = [2, 32], strides = [1, 1]} : vector<4x32xf32> to vector<2x32xf32>
    %61 = vector.extract_strided_slice %58 {offsets = [0, 0], sizes = [2, 128], strides = [1, 1]} : vector<4x128xf32> to vector<2x128xf32>
    %62 = arith.truncf %60 : vector<2x32xf32> to vector<2x32xbf16>
    %cst_18 = arith.constant dense<0.000000e+00> : vector<2x128xf32>
    %63 = tpu.matmul %62, %59, %cst_18 {dimension_numbers = #tpu.dot_dimension_numbers<[1], [0], [0], [1], [0, 0, 1, 1], [], []>} : vector<2x32xbf16>, vector<32x128xbf16>, vector<2x128xf32> -> vector<2x128xf32>
    %64 = arith.addf %61, %63 : vector<2x128xf32>
    %65 = arith.negf %64 : vector<2x128xf32>
    %66 = math.exp %65 : vector<2x128xf32>
    %cst_19 = arith.constant 1.000000e+00 : f32
    %67 = vector.broadcast %cst_19 : f32 to vector<2x128xf32>
    %68 = arith.addf %67, %66 : vector<2x128xf32>
    %69 = arith.divf %67, %68 : vector<2x128xf32>
    %70 = math.tanh %64 : vector<2x128xf32>
    %71 = vector.extract_strided_slice %69 {offsets = [0, 0], sizes = [2, 32], strides = [1, 1]} : vector<2x128xf32> to vector<2x32xf32>
    %72 = vector.extract_strided_slice %69 {offsets = [0, 32], sizes = [2, 32], strides = [1, 1]} : vector<2x128xf32> to vector<2x32xf32>
    %73 = vector.extract_strided_slice %70 {offsets = [0, 64], sizes = [2, 32], strides = [1, 1]} : vector<2x128xf32> to vector<2x32xf32>
    %74 = vector.extract_strided_slice %69 {offsets = [0, 96], sizes = [2, 32], strides = [1, 1]} : vector<2x128xf32> to vector<2x32xf32>
    %75 = arith.mulf %72, %60 : vector<2x32xf32>
    %76 = arith.mulf %71, %73 : vector<2x32xf32>
    %77 = arith.addf %75, %76 : vector<2x32xf32>
    %78 = math.tanh %77 : vector<2x32xf32>
    %79 = arith.mulf %74, %78 : vector<2x32xf32>
    %80 = vector.extract_strided_slice %58 {offsets = [2, 0], sizes = [2, 128], strides = [1, 1]} : vector<4x128xf32> to vector<2x128xf32>
    %81 = arith.truncf %79 : vector<2x32xf32> to vector<2x32xbf16>
    %cst_20 = arith.constant dense<0.000000e+00> : vector<2x128xf32>
    %82 = tpu.matmul %81, %59, %cst_20 {dimension_numbers = #tpu.dot_dimension_numbers<[1], [0], [0], [1], [0, 0, 1, 1], [], []>} : vector<2x32xbf16>, vector<32x128xbf16>, vector<2x128xf32> -> vector<2x128xf32>
    %83 = arith.addf %80, %82 : vector<2x128xf32>
    %84 = arith.negf %83 : vector<2x128xf32>
    %85 = math.exp %84 : vector<2x128xf32>
    %cst_21 = arith.constant 1.000000e+00 : f32
    %86 = vector.broadcast %cst_21 : f32 to vector<2x128xf32>
    %87 = arith.addf %86, %85 : vector<2x128xf32>
    %88 = arith.divf %86, %87 : vector<2x128xf32>
    %89 = math.tanh %83 : vector<2x128xf32>
    %90 = vector.extract_strided_slice %88 {offsets = [0, 0], sizes = [2, 32], strides = [1, 1]} : vector<2x128xf32> to vector<2x32xf32>
    %91 = vector.extract_strided_slice %88 {offsets = [0, 32], sizes = [2, 32], strides = [1, 1]} : vector<2x128xf32> to vector<2x32xf32>
    %92 = vector.extract_strided_slice %89 {offsets = [0, 64], sizes = [2, 32], strides = [1, 1]} : vector<2x128xf32> to vector<2x32xf32>
    %93 = vector.extract_strided_slice %88 {offsets = [0, 96], sizes = [2, 32], strides = [1, 1]} : vector<2x128xf32> to vector<2x32xf32>
    %94 = arith.mulf %91, %77 : vector<2x32xf32>
    %95 = arith.mulf %90, %92 : vector<2x32xf32>
    %96 = arith.addf %94, %95 : vector<2x32xf32>
    %97 = math.tanh %96 : vector<2x32xf32>
    %98 = arith.mulf %93, %97 : vector<2x32xf32>
    %99 = arith.truncf %98 : vector<2x32xf32> to vector<2x32xbf16>
    %c0_22 = arith.constant 0 : index
    %c0_23 = arith.constant 0 : index
    %100 = vector.load %arg7[%c0_22, %c0_23] : memref<32x128xbf16, #tpu.memory_space<vmem>>, vector<32x128xbf16>
    %cst_24 = arith.constant dense<0.000000e+00> : vector<2x128xf32>
    %101 = tpu.matmul %99, %100, %cst_24 {dimension_numbers = #tpu.dot_dimension_numbers<[1], [0], [0], [1], [0, 0, 1, 1], [], []>} : vector<2x32xbf16>, vector<32x128xbf16>, vector<2x128xf32> -> vector<2x128xf32>
    %c0_25 = arith.constant 0 : index
    %c0_26 = arith.constant 0 : index
    %102 = vector.load %arg8[%c0_25, %c0_26] : memref<1x128xf32, #tpu.memory_space<vmem>>, vector<1x128xf32>
    %103 = vector.broadcast %102 : vector<1x128xf32> to vector<2x128xf32>
    %104 = arith.addf %101, %103 : vector<2x128xf32>
    %c0_27 = arith.constant 0 : index
    %c0_28 = arith.constant 0 : index
    %105 = vector.load %arg9[%c0_27, %c0_28] : memref<2x128xf32, #tpu.memory_space<vmem>>, vector<2x128xf32>
    tpu.vector_store %arg9[%c0_27, %c0_28], %104 {strides = array<i32>} : memref<2x128xf32, #tpu.memory_space<vmem>>, vector<2x128xf32>,
    return
  }
}

</mosaic_0001>

<bundles_post_ra>
// kernel: tpu_custom_call.1
= control target key start
LH: loop header
LB: loop body
LE: loop exit
PB: predicated region body
PF: predicated region fallthrough
CT: control target
= control target key end

     0   :  { %s4459_s0 = inlined_call_operand.vmem [shape: f32[4,2048], index: 0, kind: input, shape index: {}]   ;;  %s4460_s1 = inlined_call_operand.vmem [shape: bf16[2048,160], index: 1, kind: input, shape index: {}]   ;;  %s4461_s2 = inlined_call_operand.vmem [shape: f32[1,160], index: 2, kind: input, shape index: {}]   ;;  %s4462_s3 = inlined_call_operand.vmem [shape: bf16[32,128], index: 3, kind: input, shape index: {}]   ;;  %s4463_s4 = inlined_call_operand.vmem [shape: bf16[32,128], index: 4, kind: input, shape index: {}]   ;;  %s4464_s5 = inlined_call_operand.vmem [shape: bf16[32,128], index: 5, kind: input, shape index: {}]   ;;  %s4465_s6 = inlined_call_operand.vmem [shape: f32[1,128], index: 6, kind: input, shape index: {}]   ;;  %s4466_s7 = inlined_call_operand.vmem [shape: bf16[32,128], index: 7, kind: input, shape index: {}]   ;;  %s4467_s8 = inlined_call_operand.vmem [shape: f32[1,128], index: 8, kind: input, shape index: {}]   ;;  %s4468_s9 = inlined_call_operand.hbm [shape: f32[2,128], index: 9, kind: output, shape index: {}]  }
   0x1   :  { %v2957_v0 = vld [vmem:[%s4460_s1 + $0x4] ss:$8 sps:$4 sm:$0xff]   ;;  %v2961_v2 = vld [vmem:[%s4460_s1] ss:$8 sps:$4 sm:$0xff]   ;;  %v2963_v4 = vld [vmem:[%s4460_s1 + $0x14] ss:$8 sps:$4 sm:$0xff]  }
   0x2   :  { %v2959_v1 = vld [vmem:[%s4460_s1 + $0x404] ss:$8 sps:$4 sm:$0xff]   ;;  %1630 = vmatprep.subr.bf16.mxu1 %v2957_v0  ;;  %v2962_v3 = vld [vmem:[%s4460_s1 + $0x400] ss:$8 sps:$4 sm:$0xff]   ;;  %v2965_v5 = vld [vmem:[%s4460_s1 + $0x414] ss:$8 sps:$4 sm:$0xff]  }
   0x3   :  { %1794 = vmatprep.subr.bf16.mxu0 %v2959_v1  ;;  %1631 = vmatpush1.bf16.msra.mxu1 %v2961_v2  ;;  %v2967_v6 = vld [vmem:[%s4460_s1 + $0x10] ss:$8 sps:$4 sm:$0xff]   ;;  %v2969_v8 = vld [vmem:[%s4460_s1 + $0x24] ss:$8 sps:$4 sm:$0xff]   ;;  %v2973_v10 = vld [vmem:[%s4460_s1 + $0x20] ss:$8 sps:$4 sm:$0xff]  }
   0x4   :  { %1795 = vmatpush1.bf16.msra.mxu0 %v2962_v3  ;;  %1632 = vmatprep.subr.bf16.mxu1 %v2963_v4  ;;  %v2968_v7 = vld [vmem:[%s4460_s1 + $0x410] ss:$8 sps:$4 sm:$0xff]   ;;  %v2971_v9 = vld [vmem:[%s4460_s1 + $0x424] ss:$8 sps:$4 sm:$0xff]   ;;  %v2974_v11 = vld [vmem:[%s4460_s1 + $0x420] ss:$8 sps:$4 sm:$0xff]  }
   0x5   :  { %1796 = vmatprep.subr.bf16.mxu0 %v2965_v5  ;;  %v2975_v12 = vld [vmem:[%s4460_s1 + $0x34] ss:$8 sps:$4 sm:$0xff]   ;;  %v2979_v14 = vld [vmem:[%s4460_s1 + $0x30] ss:$8 sps:$4 sm:$0xff]   ;;  %v2981_v16 = vld [vmem:[%s4460_s1 + $0x44] ss:$8 sps:$4 sm:$0xff]  }
   0x6   :  { %v2977_v13 = vld [vmem:[%s4460_s1 + $0x434] ss:$8 sps:$4 sm:$0xff]   ;;  %v2980_v15 = vld [vmem:[%s4460_s1 + $0x430] ss:$8 sps:$4 sm:$0xff]   ;;  %v2983_v17 = vld [vmem:[%s4460_s1 + $0x444] ss:$8 sps:$4 sm:$0xff]  }
   0x7   :  { %1633 = vmatpush1.bf16.msra.mxu1 %v2967_v6  ;;  %v2985_v18 = vld [vmem:[%s4460_s1 + $0x40] ss:$8 sps:$4 sm:$0xff]   ;;  %v2987_v20 = vld [vmem:[%s4460_s1 + $0x54] ss:$8 sps:$4 sm:$0xff]   ;;  %v2991_v22 = vld [vmem:[%s4460_s1 + $0x50] ss:$8 sps:$4 sm:$0xff]  }
   0x8   :  { %1797 = vmatpush1.bf16.msra.mxu0 %v2968_v7  ;;  %1634 = vmatprep.subr.bf16.mxu1 %v2969_v8  ;;  %v2986_v19 = vld [vmem:[%s4460_s1 + $0x440] ss:$8 sps:$4 sm:$0xff]   ;;  %v2989_v21 = vld [vmem:[%s4460_s1 + $0x454] ss:$8 sps:$4 sm:$0xff]   ;;  %v2992_v23 = vld [vmem:[%s4460_s1 + $0x450] ss:$8 sps:$4 sm:$0xff]  }
   0x9   :  { %1798 = vmatprep.subr.bf16.mxu0 %v2971_v9  ;;  %v2993_v24 = vld [vmem:[%s4460_s1 + $0x64] ss:$8 sps:$4 sm:$0xff]   ;;  %v2997_v26 = vld [vmem:[%s4460_s1 + $0x60] ss:$8 sps:$4 sm:$0xff]   ;;  %v2999_v28 = vld [vmem:[%s4460_s1 + $0x74] ss:$8 sps:$4 sm:$0xff]  }
   0xa   :  { %v2995_v25 = vld [vmem:[%s4460_s1 + $0x464] ss:$8 sps:$4 sm:$0xff]   ;;  %v2998_v27 = vld [vmem:[%s4460_s1 + $0x460] ss:$8 sps:$4 sm:$0xff]   ;;  %v3001_v29 = vld [vmem:[%s4460_s1 + $0x474] ss:$8 sps:$4 sm:$0xff]  }
   0xb   :  { %1635 = vmatpush1.bf16.msra.mxu1 %v2973_v10  ;;  %v3003_v30 = vld [vmem:[%s4460_s1 + $0x70] ss:$8 sps:$4 sm:$0xff]   ;;  %v3005_v32 = vld [vmem:[%s4460_s1 + $0x84] ss:$8 sps:$4 sm:$0xff]   ;;  %v3009_v34 = vld [vmem:[%s4460_s1 + $0x80] ss:$8 sps:$4 sm:$0xff]  }
   0xc   :  { %1799 = vmatpush1.bf16.msra.mxu0 %v2974_v11  ;;  %1636 = vmatprep.subr.bf16.mxu1 %v2975_v12  ;;  %v3004_v31 = vld [vmem:[%s4460_s1 + $0x470] ss:$8 sps:$4 sm:$0xff]   ;;  %v3007_v33 = vld [vmem:[%s4460_s1 + $0x484] ss:$8 sps:$4 sm:$0xff]   ;;  %v3010_v35 = vld [vmem:[%s4460_s1 + $0x480] ss:$8 sps:$4 sm:$0xff]  }
   0xd   :  { %1800 = vmatprep.subr.bf16.mxu0 %v2977_v13  ;;  %v3011_v36 = vld [vmem:[%s4460_s1 + $0x94] ss:$8 sps:$4 sm:$0xff]   ;;  %v3015_v38 = vld [vmem:[%s4460_s1 + $0x90] ss:$8 sps:$4 sm:$0xff]   ;;  %v3017_v40 = vld [vmem:[%s4460_s1 + $0xa4] ss:$8 sps:$4 sm:$0xff]  }
   0xe   :  { %v3013_v37 = vld [vmem:[%s4460_s1 + $0x494] ss:$8 sps:$4 sm:$0xff]   ;;  %v3016_v39 = vld [vmem:[%s4460_s1 + $0x490] ss:$8 sps:$4 sm:$0xff]   ;;  %v3019_v41 = vld [vmem:[%s4460_s1 + $0x4a4] ss:$8 sps:$4 sm:$0xff]  }
   0xf   :  { %1637 = vmatpush1.bf16.msra.mxu1 %v2979_v14  ;;  %v3021_v42 = vld [vmem:[%s4460_s1 + $0xa0] ss:$8 sps:$4 sm:$0xff]   ;;  %v3023_v44 = vld [vmem:[%s4460_s1 + $0xb4] ss:$8 sps:$4 sm:$0xff]   ;;  %v3027_v47 = vld [vmem:[%s4460_s1 + $0xb0] ss:$8 sps:$4 sm:$0xff]  }
  0x10   :  { %1801 = vmatpush1.bf16.msra.mxu0 %v2980_v15  ;;  %1638 = vmatprep.subr.bf16.mxu1 %v2981_v16  ;;  %v3022_v43 = vld [vmem:[%s4460_s1 + $0x4a0] ss:$8 sps:$4 sm:$0xff]   ;;  %v3025_v45 = vld [vmem:[%s4460_s1 + $0x4b4] ss:$8 sps:$4 sm:$0xff]   ;;  %v3028_v49 = vld [vmem:[%s4460_s1 + $0x4b0] ss:$8 sps:$4 sm:$0xff]  }
  0x11   :  { %1802 = vmatprep.subr.bf16.mxu0 %v2983_v17  ;;  %v34_v46 = vld [vmem:[%s4459_s0] sm:$0xff]  ;;  %v3035_v58 = vld [vmem:[%s4460_s1 + $0xd4] ss:$8 sps:$4 sm:$0xff]   ;;  %v3039_v60 = vld [vmem:[%s4460_s1 + $0xd0] ss:$8 sps:$4 sm:$0xff]  }
  0x12   :  { %v50_v48 = vcombine.high %v34_v46, %v34_v46  ;;  %v38_v50 = vld [vmem:[%s4459_s0 + $0x20] sm:$0xff]  ;;  %v3037_v59 = vld [vmem:[%s4460_s1 + $0x4d4] ss:$8 sps:$4 sm:$0xff]   ;;  %v3040_v61 = vld [vmem:[%s4460_s1 + $0x4d0] ss:$8 sps:$4 sm:$0xff]   ;;  %v66_v8 = vpack.c.bf16 %v34_v46, %v34_v46 }
  0x13   :  { %1639 = vmatpush1.bf16.msra.mxu1 %v2985_v18  ;;  %v3029_v51 = vld [vmem:[%s4460_s1 + $0xc4] ss:$8 sps:$4 sm:$0xff]   ;;  %v54_v54 = vcombine.high %v38_v50, %v38_v50  ;;  %v3033_v56 = vld [vmem:[%s4460_s1 + $0xc0] ss:$8 sps:$4 sm:$0xff]   ;;  %v3047_v2 = vld [vmem:[%s4460_s1 + $0xf4] ss:$8 sps:$4 sm:$0xff]   ;;  %v74_v9 = vpack.c.bf16 %v38_v50, %v38_v50 }
  0x14   :  { %1803 = vmatpush1.bf16.msra.mxu0 %v2986_v19  ;;  %1640 = vmatprep.subr.bf16.mxu1 %v2987_v20  ;;  %v3031_v52 = vld [vmem:[%s4460_s1 + $0x4c4] ss:$8 sps:$4 sm:$0xff]   ;;  %v67_v53 = vpack.c.bf16 %v50_v48, %v50_v48  ;;  %v3034_v57 = vld [vmem:[%s4460_s1 + $0x4c0] ss:$8 sps:$4 sm:$0xff]   ;;  %v3049_v3 = vld [vmem:[%s4460_s1 + $0x4f4] ss:$8 sps:$4 sm:$0xff]  }
  0x15   :  { %1804 = vmatprep.subr.bf16.mxu0 %v2989_v21  ;;  %v75_v55 = vpack.c.bf16 %v54_v54, %v54_v54  ;;  %v3041_v62 = vld [vmem:[%s4460_s1 + $0xe4] ss:$8 sps:$4 sm:$0xff]   ;;  %v3045_v0 = vld [vmem:[%s4460_s1 + $0xe0] ss:$8 sps:$4 sm:$0xff]   ;;  %v3051_v4 = vld [vmem:[%s4460_s1 + $0xf0] ss:$8 sps:$4 sm:$0xff]  }
  0x16   :  { %1662 = vmatprep.mubr.bf16.mxu1 %v67_v53  ;;  %v3043_v63 = vld [vmem:[%s4460_s1 + $0x4e4] ss:$8 sps:$4 sm:$0xff]   ;;  %v3046_v1 = vld [vmem:[%s4460_s1 + $0x4e0] ss:$8 sps:$4 sm:$0xff]   ;;  %v3052_v5 = vld [vmem:[%s4460_s1 + $0x4f0] ss:$8 sps:$4 sm:$0xff]  }
  0x17   :  { %1641 = vmatpush1.bf16.msra.mxu1 %v2991_v22  ;;  %1826 = vmatprep.mubr.bf16.mxu0 %v75_v55  ;;  %v3056_v6 = vld [vmem:[%s4460_s1 + $0x104] ss:$8 sps:$4 sm:$0xff]   ;;  %v3054_v10 = vld [vmem:[%s4460_s1 + $0x100] ss:$8 sps:$4 sm:$0xff]   ;;  %v3063_v12 = vld [vmem:[%s4460_s1 + $0x114] ss:$8 sps:$4 sm:$0xff]  }
  0x18   :  { %1805 = vmatpush1.bf16.msra.mxu0 %v2992_v23  ;;  %1642 = vmatprep.subr.bf16.mxu1 %v2993_v24  ;;  %v3060_v7 = vld [vmem:[%s4460_s1 + $0x504] ss:$8 sps:$4 sm:$0xff]   ;;  %v3058_v11 = vld [vmem:[%s4460_s1 + $0x500] ss:$8 sps:$4 sm:$0xff]   ;;  %v3066_v13 = vld [vmem:[%s4460_s1 + $0x514] ss:$8 sps:$4 sm:$0xff]  }
  0x19   :  { %1806 = vmatprep.subr.bf16.mxu0 %v2995_v25  ;;  %v3061_v14 = vld [vmem:[%s4460_s1 + $0x110] ss:$8 sps:$4 sm:$0xff]   ;;  %v3069_v16 = vld [vmem:[%s4460_s1 + $0x124] ss:$8 sps:$4 sm:$0xff]   ;;  %v3067_v18 = vld [vmem:[%s4460_s1 + $0x120] ss:$8 sps:$4 sm:$0xff]  }
  0x1a   :  { %v3064_v15 = vld [vmem:[%s4460_s1 + $0x510] ss:$8 sps:$4 sm:$0xff]   ;;  %v3072_v17 = vld [vmem:[%s4460_s1 + $0x524] ss:$8 sps:$4 sm:$0xff]   ;;  %v3070_v19 = vld [vmem:[%s4460_s1 + $0x520] ss:$8 sps:$4 sm:$0xff]  }
  0x1b   :  { %1643 = vmatpush1.bf16.msra.mxu1 %v2997_v26  ;;  %v3075_v20 = vld [vmem:[%s4460_s1 + $0x134] ss:$8 sps:$4 sm:$0xff]   ;;  %v3073_v22 = vld [vmem:[%s4460_s1 + $0x130] ss:$8 sps:$4 sm:$0xff]   ;;  %v3081_v24 = vld [vmem:[%s4460_s1 + $0x144] ss:$8 sps:$4 sm:$0xff]  }
  0x1c   :  { %1807 = vmatpush1.bf16.msra.mxu0 %v2998_v27  ;;  %1644 = vmatprep.subr.bf16.mxu1 %v2999_v28  ;;  %v3078_v21 = vld [vmem:[%s4460_s1 + $0x534] ss:$8 sps:$4 sm:$0xff]   ;;  %v3076_v23 = vld [vmem:[%s4460_s1 + $0x530] ss:$8 sps:$4 sm:$0xff]   ;;  %v3084_v25 = vld [vmem:[%s4460_s1 + $0x544] ss:$8 sps:$4 sm:$0xff]  }
  0x1d   :  { %1808 = vmatprep.subr.bf16.mxu0 %v3001_v29  ;;  %v3079_v26 = vld [vmem:[%s4460_s1 + $0x140] ss:$8 sps:$4 sm:$0xff]   ;;  %v3087_v28 = vld [vmem:[%s4460_s1 + $0x154] ss:$8 sps:$4 sm:$0xff]   ;;  %v3105_v46 = vld [vmem:[%s4460_s1 + $0x184] ss:$8 sps:$4 sm:$0xff]  }
  0x1e   :  { %v3082_v27 = vld [vmem:[%s4460_s1 + $0x540] ss:$8 sps:$4 sm:$0xff]   ;;  %v3090_v29 = vld [vmem:[%s4460_s1 + $0x554] ss:$8 sps:$4 sm:$0xff]   ;;  %v3112_v53 = vld [vmem:[%s4460_s1 + $0x590] ss:$8 sps:$4 sm:$0xff]  }
  0x1f   :  { %1645 = vmatpush1.bf16.msra.mxu1 %v3003_v30  ;;  %v3085_v30 = vld [vmem:[%s4460_s1 + $0x150] ss:$8 sps:$4 sm:$0xff]   ;;  %v3103_v48 = vld [vmem:[%s4460_s1 + $0x180] ss:$8 sps:$4 sm:$0xff]   ;;  %v3111_v50 = vld [vmem:[%s4460_s1 + $0x194] ss:$8 sps:$4 sm:$0xff]  }
  0x20   :  { %1809 = vmatpush1.bf16.msra.mxu0 %v3004_v31  ;;  %1646 = vmatprep.subr.bf16.mxu1 %v3005_v32  ;;  %v3088_v31 = vld [vmem:[%s4460_s1 + $0x550] ss:$8 sps:$4 sm:$0xff]   ;;  %v3093_v32 = vld [vmem:[%s4460_s1 + $0x164] ss:$8 sps:$4 sm:$0xff]  }
  0x21   :  { %1810 = vmatprep.subr.bf16.mxu0 %v3007_v33  ;;  %v3096_v33 = vld [vmem:[%s4460_s1 + $0x564] ss:$8 sps:$4 sm:$0xff]  }
  0x22   :  { %v3117_v54 = vld [vmem:[%s4460_s1 + $0x1a4] ss:$8 sps:$4 sm:$0xff]  }
  0x23   :  { %1647 = vmatpush1.bf16.msra.mxu1 %v3009_v34  ;;  %v3764_v34 = vld [vmem:[%s4459_s0 + $0x8] sm:$0xff] }
  0x24   :  { %1811 = vmatpush1.bf16.msra.mxu0 %v3010_v35  ;;  %1648 = vmatprep.subr.bf16.mxu1 %v3011_v36  ;;  %v3091_v35 = vld [vmem:[%s4460_s1 + $0x160] ss:$8 sps:$4 sm:$0xff]   ;;  %v3120_v55 = vld [vmem:[%s4460_s1 + $0x5a4] ss:$8 sps:$4 sm:$0xff]  }
  0x25   :  { %1812 = vmatprep.subr.bf16.mxu0 %v3013_v37  ;;  %v3094_v36 = vld [vmem:[%s4460_s1 + $0x560] ss:$8 sps:$4 sm:$0xff]   ;;  %v51_v37 = vcombine.high %v3764_v34, %v3764_v34 }
  0x27   :  { %1649 = vmatpush1.bf16.msra.mxu1 %v3015_v38  ;;  %v3777_v38 = vld [vmem:[%s4459_s0 + $0x28] sm:$0xff] }
  0x28   :  { %1813 = vmatpush1.bf16.msra.mxu0 %v3016_v39  ;;  %1650 = vmatprep.subr.bf16.mxu1 %v3017_v40  ;;  %v3099_v39 = vld [vmem:[%s4460_s1 + $0x174] ss:$8 sps:$4 sm:$0xff]   ;;  %v55_v40 = vcombine.high %v3777_v38, %v3777_v38 }
  0x29   :  { %1814 = vmatprep.subr.bf16.mxu0 %v3019_v41  ;;  %v3102_v41 = vld [vmem:[%s4460_s1 + $0x574] ss:$8 sps:$4 sm:$0xff]  }
  0x2b   :  { %1651 = vmatpush1.bf16.msra.mxu1 %v3021_v42  ;;  %v69_v42 = vpack.c.bf16 %v51_v37, %v51_v37  ;;  %v3174_v37 = vld [vmem:[%s4460_s1 + $0x630] ss:$8 sps:$4 sm:$0xff]  }
  0x2c   :  { %1815 = vmatpush1.bf16.msra.mxu0 %v3022_v43  ;;  %1652 = vmatprep.subr.bf16.mxu1 %v3023_v44  ;;  %v77_v43 = vpack.c.bf16 %v55_v40, %v55_v40  ;;  %v3097_v44 = vld [vmem:[%s4460_s1 + $0x170] ss:$8 sps:$4 sm:$0xff]   ;;  %v3177_v40 = vld [vmem:[%s4460_s1 + $0x240] ss:$8 sps:$4 sm:$0xff]  }
  0x2d   :  { %1816 = vmatprep.subr.bf16.mxu0 %v3025_v45  ;;  %v3100_v45 = vld [vmem:[%s4460_s1 + $0x570] ss:$8 sps:$4 sm:$0xff]  }
  0x2f   :  { %1653 = vmatpush1.bf16.msra.mxu1 %v3027_v47  ;;  %v3108_v47 = vld [vmem:[%s4460_s1 + $0x584] ss:$8 sps:$4 sm:$0xff]  }
  0x30   :  { %1817 = vmatpush1.bf16.msra.mxu0 %v3028_v49  ;;  %1654 = vmatprep.subr.bf16.mxu1 %v3029_v51  ;;  %v3106_v49 = vld [vmem:[%s4460_s1 + $0x580] ss:$8 sps:$4 sm:$0xff]   ;;  %v3114_v51 = vld [vmem:[%s4460_s1 + $0x594] ss:$8 sps:$4 sm:$0xff]  }
  0x31   :  { %1818 = vmatprep.subr.bf16.mxu0 %v3031_v52  ;;  %v3109_v52 = vld [vmem:[%s4460_s1 + $0x190] ss:$8 sps:$4 sm:$0xff]  }
  0x33   :  { %1655 = vmatpush1.bf16.msra.mxu1 %v3033_v56  ;;  %v3115_v56 = vld [vmem:[%s4460_s1 + $0x1a0] ss:$8 sps:$4 sm:$0xff]  }
  0x34   :  { %1819 = vmatpush1.bf16.msra.mxu0 %v3034_v57  ;;  %1656 = vmatprep.subr.bf16.mxu1 %v3035_v58  ;;  %v3118_v57 = vld [vmem:[%s4460_s1 + $0x5a0] ss:$8 sps:$4 sm:$0xff]   ;;  %v3123_v58 = vld [vmem:[%s4460_s1 + $0x1b4] ss:$8 sps:$4 sm:$0xff]  }
  0x35   :  { %1820 = vmatprep.subr.bf16.mxu0 %v3037_v59  ;;  %v3126_v59 = vld [vmem:[%s4460_s1 + $0x5b4] ss:$8 sps:$4 sm:$0xff]  }
  0x37   :  { %1657 = vmatpush1.bf16.msra.mxu1 %v3039_v60  ;;  %v3121_v60 = vld [vmem:[%s4460_s1 + $0x1b0] ss:$8 sps:$4 sm:$0xff]  }
  0x38   :  { %1821 = vmatpush1.bf16.msra.mxu0 %v3040_v61  ;;  %1658 = vmatprep.subr.bf16.mxu1 %v3041_v62  ;;  %v3124_v61 = vld [vmem:[%s4460_s1 + $0x5b0] ss:$8 sps:$4 sm:$0xff]   ;;  %v3129_v62 = vld [vmem:[%s4460_s1 + $0x1c4] ss:$8 sps:$4 sm:$0xff]  }
  0x39   :  { %1822 = vmatprep.subr.bf16.mxu0 %v3043_v63  ;;  %v3132_v63 = vld [vmem:[%s4460_s1 + $0x5c4] ss:$8 sps:$4 sm:$0xff]  }
  0x3b   :  { %1659 = vmatpush1.bf16.msra.mxu1 %v3045_v0  ;;  %v3127_v0 = vld [vmem:[%s4460_s1 + $0x1c0] ss:$8 sps:$4 sm:$0xff]  }
  0x3c   :  { %1823 = vmatpush1.bf16.msra.mxu0 %v3046_v1  ;;  %1660 = vmatprep.subr.bf16.mxu1 %v3047_v2  ;;  %v3130_v1 = vld [vmem:[%s4460_s1 + $0x5c0] ss:$8 sps:$4 sm:$0xff]   ;;  %v3135_v2 = vld [vmem:[%s4460_s1 + $0x1d4] ss:$8 sps:$4 sm:$0xff]  }
  0x3d   :  { %1824 = vmatprep.subr.bf16.mxu0 %v3049_v3  ;;  %v3138_v3 = vld [vmem:[%s4460_s1 + $0x5d4] ss:$8 sps:$4 sm:$0xff]  }
  0x3f   :  { %1661 = vmatpush1.bf16.msra.mxu1 %v3051_v4  ;;  %v3133_v4 = vld [vmem:[%s4460_s1 + $0x1d0] ss:$8 sps:$4 sm:$0xff]  }
  0x40   :  { %1825 = vmatpush1.bf16.msra.mxu0 %v3052_v5  ;;  %1671 = vmatprep.subr.bf16.mxu1 %v3056_v6  ;;  %v3136_v5 = vld [vmem:[%s4460_s1 + $0x5d0] ss:$8 sps:$4 sm:$0xff]   ;;  %v3141_v6 = vld [vmem:[%s4460_s1 + $0x1e4] ss:$8 sps:$4 sm:$0xff]  }
  0x41   :  { %1835 = vmatprep.subr.bf16.mxu0 %v3060_v7  ;;  %v3144_v7 = vld [vmem:[%s4460_s1 + $0x5e4] ss:$8 sps:$4 sm:$0xff]  }
  0x42   :  { %1663 = vmatmul.mubr.bf16.vlgmr.msra.gmra.mrb[0].mxu1 %v66_v8  ;;  %v3139_v8 = vld [vmem:[%s4460_s1 + $0x1e0] ss:$8 sps:$4 sm:$0xff]  }
  0x43   :  { %1827 = vmatmul.mubr.bf16.vlgmr.msra.gmra.mrb[0].mxu0 %v74_v9  ;;  %1672 = vmatpush1.bf16.msra.mxu1 %v3054_v10  ;;  %v3142_v9 = vld [vmem:[%s4460_s1 + $0x5e0] ss:$8 sps:$4 sm:$0xff]   ;;  %v3147_v10 = vld [vmem:[%s4460_s1 + $0x1f4] ss:$8 sps:$4 sm:$0xff]  }
  0x44   :  { %1836 = vmatpush1.bf16.msra.mxu0 %v3058_v11  ;;  %1673 = vmatprep.subr.bf16.mxu1 %v3063_v12  ;;  %v3150_v11 = vld [vmem:[%s4460_s1 + $0x5f4] ss:$8 sps:$4 sm:$0xff]   ;;  %v3145_v12 = vld [vmem:[%s4460_s1 + $0x1f0] ss:$8 sps:$4 sm:$0xff]  }
  0x45   :  { %1837 = vmatprep.subr.bf16.mxu0 %v3066_v13  ;;  %1703 = vmatprep.mubr.bf16.mxu1 %v69_v42  ;;  %v3148_v13 = vld [vmem:[%s4460_s1 + $0x5f0] ss:$8 sps:$4 sm:$0xff]   ;;  %v3185_v42 = vld [vmem:[%s4460_s1 + $0x254] ss:$8 sps:$4 sm:$0xff]  }
  0x46   :  { %1867 = vmatprep.mubr.bf16.mxu0 %v77_v43  ;;  %v3188_v43 = vld [vmem:[%s4460_s1 + $0x654] ss:$8 sps:$4 sm:$0xff]  }
  0x47   :  { %1674 = vmatpush1.bf16.msra.mxu1 %v3061_v14  ;;  %v3154_v14 = vld [vmem:[%s4460_s1 + $0x204] ss:$8 sps:$4 sm:$0xff]  }
  0x48   :  { %1838 = vmatpush1.bf16.msra.mxu0 %v3064_v15  ;;  %1675 = vmatprep.subr.bf16.mxu1 %v3069_v16  ;;  %v3158_v15 = vld [vmem:[%s4460_s1 + $0x604] ss:$8 sps:$4 sm:$0xff]   ;;  %v68_v16 = vpack.c.bf16 %v3764_v34, %v3764_v34  ;;  %v3173_v34 = vld [vmem:[%s4460_s1 + $0x234] ss:$8 sps:$4 sm:$0xff]  }
  0x49   :  { %1839 = vmatprep.subr.bf16.mxu0 %v3072_v17  ;;  %v3152_v17 = vld [vmem:[%s4460_s1 + $0x200] ss:$8 sps:$4 sm:$0xff]  }
  0x4b   :  { %1676 = vmatpush1.bf16.msra.mxu1 %v3067_v18  ;;  %v76_v18 = vpack.c.bf16 %v3777_v38, %v3777_v38  ;;  %v3179_v38 = vld [vmem:[%s4460_s1 + $0x244] ss:$8 sps:$4 sm:$0xff]  }
  0x4c   :  { %1840 = vmatpush1.bf16.msra.mxu0 %v3070_v19  ;;  %1677 = vmatprep.subr.bf16.mxu1 %v3075_v20  ;;  %v3156_v19 = vld [vmem:[%s4460_s1 + $0x600] ss:$8 sps:$4 sm:$0xff]   ;;  %v3161_v20 = vld [vmem:[%s4460_s1 + $0x214] ss:$8 sps:$4 sm:$0xff]  }
  0x4d   :  { %1841 = vmatprep.subr.bf16.mxu0 %v3078_v21  ;;  %v3164_v21 = vld [vmem:[%s4460_s1 + $0x614] ss:$8 sps:$4 sm:$0xff]  }
  0x4f   :  { %1678 = vmatpush1.bf16.msra.mxu1 %v3073_v22  ;;  %v3914_v22 = vld [vmem:[%s4459_s0 + $0x10] sm:$0xff] }
  0x50   :  { %1842 = vmatpush1.bf16.msra.mxu0 %v3076_v23  ;;  %1679 = vmatprep.subr.bf16.mxu1 %v3081_v24  ;;  %v52_v23 = vcombine.high %v3914_v22, %v3914_v22  ;;  %v3921_v24 = vld [vmem:[%s4459_s0 + $0x30] sm:$0xff] }
  0x51   :  { %1843 = vmatprep.subr.bf16.mxu0 %v3084_v25  ;;  %v3159_v25 = vld [vmem:[%s4460_s1 + $0x210] ss:$8 sps:$4 sm:$0xff]  }
  0x53   :  { %1680 = vmatpush1.bf16.msra.mxu1 %v3079_v26  ;;  %v3162_v26 = vld [vmem:[%s4460_s1 + $0x610] ss:$8 sps:$4 sm:$0xff]  }
  0x54   :  { %1844 = vmatpush1.bf16.msra.mxu0 %v3082_v27  ;;  %1681 = vmatprep.subr.bf16.mxu1 %v3087_v28  ;;  %v71_v27 = vpack.c.bf16 %v52_v23, %v52_v23  ;;  %v56_v28 = vcombine.high %v3921_v24, %v3921_v24 }
  0x55   :  { %1845 = vmatprep.subr.bf16.mxu0 %v3090_v29  ;;  %v3167_v29 = vld [vmem:[%s4460_s1 + $0x224] ss:$8 sps:$4 sm:$0xff]  }
  0x57   :  { %1682 = vmatpush1.bf16.msra.mxu1 %v3085_v30  ;;  %v3170_v30 = vld [vmem:[%s4460_s1 + $0x624] ss:$8 sps:$4 sm:$0xff]  }
  0x58   :  { %1846 = vmatpush1.bf16.msra.mxu0 %v3088_v31  ;;  %1683 = vmatprep.subr.bf16.mxu1 %v3093_v32  ;;  %v79_v31 = vpack.c.bf16 %v56_v28, %v56_v28  ;;  %v3165_v32 = vld [vmem:[%s4460_s1 + $0x220] ss:$8 sps:$4 sm:$0xff]  }
  0x59   :  { %1847 = vmatprep.subr.bf16.mxu0 %v3096_v33  ;;  %v3168_v33 = vld [vmem:[%s4460_s1 + $0x620] ss:$8 sps:$4 sm:$0xff]  }
  0x5b   :  { %1684 = vmatpush1.bf16.msra.mxu1 %v3091_v35  ;;  %v3176_v35 = vld [vmem:[%s4460_s1 + $0x634] ss:$8 sps:$4 sm:$0xff]  }
  0x5c   :  { %1848 = vmatpush1.bf16.msra.mxu0 %v3094_v36  ;;  %1685 = vmatprep.subr.bf16.mxu1 %v3099_v39  ;;  %v3171_v36 = vld [vmem:[%s4460_s1 + $0x230] ss:$8 sps:$4 sm:$0xff]   ;;  %v3182_v39 = vld [vmem:[%s4460_s1 + $0x644] ss:$8 sps:$4 sm:$0xff]  }
  0x5d   :  { %1849 = vmatprep.subr.bf16.mxu0 %v3102_v41  ;;  %v3180_v41 = vld [vmem:[%s4460_s1 + $0x640] ss:$8 sps:$4 sm:$0xff]  }
  0x5f   :  { %1686 = vmatpush1.bf16.msra.mxu1 %v3097_v44  ;;  %v3183_v44 = vld [vmem:[%s4460_s1 + $0x250] ss:$8 sps:$4 sm:$0xff]  }
  0x60   :  { %1850 = vmatpush1.bf16.msra.mxu0 %v3100_v45  ;;  %1687 = vmatprep.subr.bf16.mxu1 %v3105_v46  ;;  %v3186_v45 = vld [vmem:[%s4460_s1 + $0x650] ss:$8 sps:$4 sm:$0xff]   ;;  %v3191_v46 = vld [vmem:[%s4460_s1 + $0x264] ss:$8 sps:$4 sm:$0xff]  }
  0x61   :  { %1851 = vmatprep.subr.bf16.mxu0 %v3108_v47  ;;  %v3194_v47 = vld [vmem:[%s4460_s1 + $0x664] ss:$8 sps:$4 sm:$0xff]  }
  0x63   :  { %1688 = vmatpush1.bf16.msra.mxu1 %v3103_v48  ;;  %v3189_v48 = vld [vmem:[%s4460_s1 + $0x260] ss:$8 sps:$4 sm:$0xff]  }
  0x64   :  { %1852 = vmatpush1.bf16.msra.mxu0 %v3106_v49  ;;  %1689 = vmatprep.subr.bf16.mxu1 %v3111_v50  ;;  %v3192_v49 = vld [vmem:[%s4460_s1 + $0x660] ss:$8 sps:$4 sm:$0xff]   ;;  %v3197_v50 = vld [vmem:[%s4460_s1 + $0x274] ss:$8 sps:$4 sm:$0xff]  }
  0x65   :  { %1853 = vmatprep.subr.bf16.mxu0 %v3114_v51  ;;  %v3200_v51 = vld [vmem:[%s4460_s1 + $0x674] ss:$8 sps:$4 sm:$0xff]  }
  0x67   :  { %1690 = vmatpush1.bf16.msra.mxu1 %v3109_v52  ;;  %v3195_v52 = vld [vmem:[%s4460_s1 + $0x270] ss:$8 sps:$4 sm:$0xff]  }
  0x68   :  { %1854 = vmatpush1.bf16.msra.mxu0 %v3112_v53  ;;  %1691 = vmatprep.subr.bf16.mxu1 %v3117_v54  ;;  %v3198_v53 = vld [vmem:[%s4460_s1 + $0x670] ss:$8 sps:$4 sm:$0xff]   ;;  %v3203_v54 = vld [vmem:[%s4460_s1 + $0x284] ss:$8 sps:$4 sm:$0xff]  }
  0x69   :  { %1855 = vmatprep.subr.bf16.mxu0 %v3120_v55  ;;  %v3206_v55 = vld [vmem:[%s4460_s1 + $0x684] ss:$8 sps:$4 sm:$0xff]  }
  0x6b   :  { %1692 = vmatpush1.bf16.msra.mxu1 %v3115_v56  ;;  %v3201_v56 = vld [vmem:[%s4460_s1 + $0x280] ss:$8 sps:$4 sm:$0xff]  }
  0x6c   :  { %1856 = vmatpush1.bf16.msra.mxu0 %v3118_v57  ;;  %1693 = vmatprep.subr.bf16.mxu1 %v3123_v58  ;;  %v3204_v57 = vld [vmem:[%s4460_s1 + $0x680] ss:$8 sps:$4 sm:$0xff]   ;;  %v3209_v58 = vld [vmem:[%s4460_s1 + $0x294] ss:$8 sps:$4 sm:$0xff]  }
  0x6d   :  { %1857 = vmatprep.subr.bf16.mxu0 %v3126_v59  ;;  %v3212_v59 = vld [vmem:[%s4460_s1 + $0x694] ss:$8 sps:$4 sm:$0xff]  }
  0x6f   :  { %1694 = vmatpush1.bf16.msra.mxu1 %v3121_v60  ;;  %v3207_v60 = vld [vmem:[%s4460_s1 + $0x290] ss:$8 sps:$4 sm:$0xff]  }
  0x70   :  { %1858 = vmatpush1.bf16.msra.mxu0 %v3124_v61  ;;  %1695 = vmatprep.subr.bf16.mxu1 %v3129_v62  ;;  %v3210_v61 = vld [vmem:[%s4460_s1 + $0x690] ss:$8 sps:$4 sm:$0xff]   ;;  %v3215_v62 = vld [vmem:[%s4460_s1 + $0x2a4] ss:$8 sps:$4 sm:$0xff]  }
  0x71   :  { %1859 = vmatprep.subr.bf16.mxu0 %v3132_v63  ;;  %v3218_v63 = vld [vmem:[%s4460_s1 + $0x6a4] ss:$8 sps:$4 sm:$0xff]  }
  0x73   :  { %1696 = vmatpush1.bf16.msra.mxu1 %v3127_v0  ;;  %v3213_v0 = vld [vmem:[%s4460_s1 + $0x2a0] ss:$8 sps:$4 sm:$0xff]  }
  0x74   :  { %1860 = vmatpush1.bf16.msra.mxu0 %v3130_v1  ;;  %1697 = vmatprep.subr.bf16.mxu1 %v3135_v2  ;;  %v3216_v1 = vld [vmem:[%s4460_s1 + $0x6a0] ss:$8 sps:$4 sm:$0xff]   ;;  %v3221_v2 = vld [vmem:[%s4460_s1 + $0x2b4] ss:$8 sps:$4 sm:$0xff]  }
  0x75   :  { %1861 = vmatprep.subr.bf16.mxu0 %v3138_v3  ;;  %v3224_v3 = vld [vmem:[%s4460_s1 + $0x6b4] ss:$8 sps:$4 sm:$0xff]  }
  0x77   :  { %1698 = vmatpush1.bf16.msra.mxu1 %v3133_v4  ;;  %v3219_v4 = vld [vmem:[%s4460_s1 + $0x2b0] ss:$8 sps:$4 sm:$0xff]  }
  0x78   :  { %1862 = vmatpush1.bf16.msra.mxu0 %v3136_v5  ;;  %1699 = vmatprep.subr.bf16.mxu1 %v3141_v6  ;;  %v3222_v5 = vld [vmem:[%s4460_s1 + $0x6b0] ss:$8 sps:$4 sm:$0xff]   ;;  %v3227_v6 = vld [vmem:[%s4460_s1 + $0x2c4] ss:$8 sps:$4 sm:$0xff]  }
  0x79   :  { %1863 = vmatprep.subr.bf16.mxu0 %v3144_v7  ;;  %v3230_v7 = vld [vmem:[%s4460_s1 + $0x6c4] ss:$8 sps:$4 sm:$0xff]  }
  0x7b   :  { %1700 = vmatpush1.bf16.msra.mxu1 %v3139_v8  ;;  %v3225_v8 = vld [vmem:[%s4460_s1 + $0x2c0] ss:$8 sps:$4 sm:$0xff]  }
  0x7c   :  { %1864 = vmatpush1.bf16.msra.mxu0 %v3142_v9  ;;  %1701 = vmatprep.subr.bf16.mxu1 %v3147_v10  ;;  %v3228_v9 = vld [vmem:[%s4460_s1 + $0x6c0] ss:$8 sps:$4 sm:$0xff]   ;;  %v3233_v10 = vld [vmem:[%s4460_s1 + $0x2d4] ss:$8 sps:$4 sm:$0xff]  }
  0x7d   :  { %1865 = vmatprep.subr.bf16.mxu0 %v3150_v11  ;;  %v3236_v11 = vld [vmem:[%s4460_s1 + $0x6d4] ss:$8 sps:$4 sm:$0xff]  }
  0x7f   :  { %1702 = vmatpush1.bf16.msra.mxu1 %v3145_v12 }
  0x80   :  { %1866 = vmatpush1.bf16.msra.mxu0 %v3148_v13  ;;  %1712 = vmatprep.subr.bf16.mxu1 %v3154_v14 }
  0x81   :  { %1876 = vmatprep.subr.bf16.mxu0 %v3158_v15 }
  0x82   :  { %1704 = vmatmul.mubr.bf16.vlgmr.msra.gmra.mrb[0].mxu1 %v68_v16 }
  0x83   :  { %1868 = vmatmul.mubr.bf16.vlgmr.msra.gmra.mrb[0].mxu0 %v76_v18  ;;  %1713 = vmatpush1.bf16.msra.mxu1 %v3152_v17 }
  0x84   :  { %1877 = vmatpush1.bf16.msra.mxu0 %v3156_v19  ;;  %1714 = vmatprep.subr.bf16.mxu1 %v3161_v20 }
  0x85   :  { %1878 = vmatprep.subr.bf16.mxu0 %v3164_v21  ;;  %1744 = vmatprep.mubr.bf16.mxu1 %v71_v27 }
  0x86   :  { %1908 = vmatprep.mubr.bf16.mxu0 %v79_v31 }
  0x87   :  { %1715 = vmatpush1.bf16.msra.mxu1 %v3159_v25 }
  0x88   :  { %1879 = vmatpush1.bf16.msra.mxu0 %v3162_v26  ;;  %1716 = vmatprep.subr.bf16.mxu1 %v3167_v29 }
  0x89   :  { %1880 = vmatprep.subr.bf16.mxu0 %v3170_v30 }
  0x8b   :  { %1717 = vmatpush1.bf16.msra.mxu1 %v3165_v32 }
  0x8c   :  { %1881 = vmatpush1.bf16.msra.mxu0 %v3168_v33  ;;  %1718 = vmatprep.subr.bf16.mxu1 %v3173_v34 }
  0x8d   :  { %1882 = vmatprep.subr.bf16.mxu0 %v3176_v35 }
  0x8f   :  { %1719 = vmatpush1.bf16.msra.mxu1 %v3171_v36 }
  0x90   :  { %1883 = vmatpush1.bf16.msra.mxu0 %v3174_v37  ;;  %1720 = vmatprep.subr.bf16.mxu1 %v3179_v38 }
  0x91   :  { %1884 = vmatprep.subr.bf16.mxu0 %v3182_v39 }
  0x93   :  { %1721 = vmatpush1.bf16.msra.mxu1 %v3177_v40 }
  0x94   :  { %1885 = vmatpush1.bf16.msra.mxu0 %v3180_v41  ;;  %1722 = vmatprep.subr.bf16.mxu1 %v3185_v42 }
  0x95   :  { %1886 = vmatprep.subr.bf16.mxu0 %v3188_v43 }
  0x97   :  { %1723 = vmatpush1.bf16.msra.mxu1 %v3183_v44 }
  0x98   :  { %1887 = vmatpush1.bf16.msra.mxu0 %v3186_v45  ;;  %1724 = vmatprep.subr.bf16.mxu1 %v3191_v46 }
  0x99   :  { %1888 = vmatprep.subr.bf16.mxu0 %v3194_v47 }
  0x9b   :  { %1725 = vmatpush1.bf16.msra.mxu1 %v3189_v48 }
  0x9c   :  { %1889 = vmatpush1.bf16.msra.mxu0 %v3192_v49  ;;  %1726 = vmatprep.subr.bf16.mxu1 %v3197_v50 }
  0x9d   :  { %1890 = vmatprep.subr.bf16.mxu0 %v3200_v51 }
  0x9f   :  { %1727 = vmatpush1.bf16.msra.mxu1 %v3195_v52 }
  0xa0   :  { %1891 = vmatpush1.bf16.msra.mxu0 %v3198_v53  ;;  %1728 = vmatprep.subr.bf16.mxu1 %v3203_v54 }
  0xa1   :  { %1892 = vmatprep.subr.bf16.mxu0 %v3206_v55 }
  0xa3   :  { %1729 = vmatpush1.bf16.msra.mxu1 %v3201_v56 }
  0xa4   :  { %1893 = vmatpush1.bf16.msra.mxu0 %v3204_v57  ;;  %1730 = vmatprep.subr.bf16.mxu1 %v3209_v58 }
  0xa5   :  { %1894 = vmatprep.subr.bf16.mxu0 %v3212_v59 }
  0xa7   :  { %1731 = vmatpush1.bf16.msra.mxu1 %v3207_v60 }
  0xa8   :  { %1895 = vmatpush1.bf16.msra.mxu0 %v3210_v61  ;;  %1732 = vmatprep.subr.bf16.mxu1 %v3215_v62 }
  0xa9   :  { %1896 = vmatprep.subr.bf16.mxu0 %v3218_v63 }
  0xab   :  { %1733 = vmatpush1.bf16.msra.mxu1 %v3213_v0 }
  0xac   :  { %1897 = vmatpush1.bf16.msra.mxu0 %v3216_v1  ;;  %1734 = vmatprep.subr.bf16.mxu1 %v3221_v2 }
  0xad   :  { %1898 = vmatprep.subr.bf16.mxu0 %v3224_v3 }
  0xaf   :  { %1735 = vmatpush1.bf16.msra.mxu1 %v3219_v4 }
  0xb0   :  { %1899 = vmatpush1.bf16.msra.mxu0 %v3222_v5  ;;  %1736 = vmatprep.subr.bf16.mxu1 %v3227_v6 }
  0xb1   :  { %1900 = vmatprep.subr.bf16.mxu0 %v3230_v7 }
  0xb2   :  { %14 = vsyncpa [#allocation3], 0  ;;  %v3231_v12 = vld [vmem:[%s4460_s1 + $0x2d0] ss:$8 sps:$4 sm:$0xff]   ;;  %v3239_v14 = vld [vmem:[%s4460_s1 + $0x2e4] ss:$8 sps:$4 sm:$0xff]   ;;  %v70_v30 = vpack.c.bf16 %v3914_v22, %v3914_v22  ;;  %v78_v31 = vpack.c.bf16 %v3921_v24, %v3921_v24 }
  0xb3   :  { %1737 = vmatpush1.bf16.msra.mxu1 %v3225_v8  ;;  %v3234_v13 = vld [vmem:[%s4460_s1 + $0x6d0] ss:$8 sps:$4 sm:$0xff]   ;;  %v3242_v15 = vld [vmem:[%s4460_s1 + $0x6e4] ss:$8 sps:$4 sm:$0xff]   ;;  %v3237_v16 = vld [vmem:[%s4460_s1 + $0x2e0] ss:$8 sps:$4 sm:$0xff]  }
  0xb4   :  { %1901 = vmatpush1.bf16.msra.mxu0 %v3228_v9  ;;  %1738 = vmatprep.subr.bf16.mxu1 %v3233_v10  ;;  %v3240_v17 = vld [vmem:[%s4460_s1 + $0x6e0] ss:$8 sps:$4 sm:$0xff]   ;;  %v3245_v18 = vld [vmem:[%s4460_s1 + $0x2f4] ss:$8 sps:$4 sm:$0xff]   ;;  %v3243_v23 = vld [vmem:[%s4460_s1 + $0x2f0] ss:$8 sps:$4 sm:$0xff]  }
  0xb5   :  { %1902 = vmatprep.subr.bf16.mxu0 %v3236_v11  ;;  %v3248_v19 = vld [vmem:[%s4460_s1 + $0x6f4] ss:$8 sps:$4 sm:$0xff]   ;;  %v3246_v25 = vld [vmem:[%s4460_s1 + $0x6f0] ss:$8 sps:$4 sm:$0xff]   ;;  %v3252_v26 = vld [vmem:[%s4460_s1 + $0x304] ss:$8 sps:$4 sm:$0xff]  }
  0xb6   :  { %v4096_v20 = vld [vmem:[%s4459_s0 + $0x18] sm:$0xff]  ;;  %v3256_v27 = vld [vmem:[%s4460_s1 + $0x704] ss:$8 sps:$4 sm:$0xff]   ;;  %v3250_v32 = vld [vmem:[%s4460_s1 + $0x300] ss:$8 sps:$4 sm:$0xff]   ;;  %vm3430_vm0 = vmmov 0  }
  0xb7   :  { %1739 = vmatpush1.bf16.msra.mxu1 %v3231_v12  ;;  %v4101_v21 = vld [vmem:[%s4459_s0 + $0x38] sm:$0xff]  ;;  %v53_v28 = vcombine.high %v4096_v20, %v4096_v20  ;;  %v3254_v33 = vld [vmem:[%s4460_s1 + $0x700] ss:$8 sps:$4 sm:$0xff]   ;;  %v3265_v38 = vld [vmem:[%s4460_s1 + $0x324] ss:$8 sps:$4 sm:$0xff]   ;;  %vm1986_vm1 = vcmask 261120  }
  0xb8   :  { %1903 = vmatpush1.bf16.msra.mxu0 %v3234_v13  ;;  %1740 = vmatprep.subr.bf16.mxu1 %v3239_v14  ;;  %v57_v29 = vcombine.high %v4101_v21, %v4101_v21  ;;  %v3259_v34 = vld [vmem:[%s4460_s1 + $0x314] ss:$8 sps:$4 sm:$0xff]   ;;  %v3257_v36 = vld [vmem:[%s4460_s1 + $0x310] ss:$8 sps:$4 sm:$0xff]   ;;  %v3268_v39 = vld [vmem:[%s4460_s1 + $0x724] ss:$8 sps:$4 sm:$0xff]  }
  0xb9   :  { %1904 = vmatprep.subr.bf16.mxu0 %v3242_v15  ;;  %v3262_v22 = vld [vmem:[%s4460_s1 + $0x714] ss:$8 sps:$4 sm:$0xff]   ;;  %v73_v24 = vpack.c.bf16 %v53_v28, %v53_v28  ;;  %v3260_v37 = vld [vmem:[%s4460_s1 + $0x710] ss:$8 sps:$4 sm:$0xff]   ;;  %v3263_v40 = vld [vmem:[%s4460_s1 + $0x320] ss:$8 sps:$4 sm:$0xff]  }
  0xba   :  { %v81_v35 = vpack.c.bf16 %v57_v29, %v57_v29  ;;  %v3266_v41 = vld [vmem:[%s4460_s1 + $0x720] ss:$8 sps:$4 sm:$0xff]   ;;  %v3271_v42 = vld [vmem:[%s4460_s1 + $0x334] ss:$8 sps:$4 sm:$0xff]   ;;  %v3269_v44 = vld [vmem:[%s4460_s1 + $0x330] ss:$8 sps:$4 sm:$0xff]  }
  0xbb   :  { %1741 = vmatpush1.bf16.msra.mxu1 %v3237_v16  ;;  %v3274_v43 = vld [vmem:[%s4460_s1 + $0x734] ss:$8 sps:$4 sm:$0xff]   ;;  %v3272_v45 = vld [vmem:[%s4460_s1 + $0x730] ss:$8 sps:$4 sm:$0xff]   ;;  %v3277_v46 = vld [vmem:[%s4460_s1 + $0x344] ss:$8 sps:$4 sm:$0xff]  }
  0xbc   :  { %1905 = vmatpush1.bf16.msra.mxu0 %v3240_v17  ;;  %1742 = vmatprep.subr.bf16.mxu1 %v3245_v18  ;;  %v3280_v47 = vld [vmem:[%s4460_s1 + $0x744] ss:$8 sps:$4 sm:$0xff]   ;;  %v3275_v48 = vld [vmem:[%s4460_s1 + $0x340] ss:$8 sps:$4 sm:$0xff]   ;;  %v3283_v50 = vld [vmem:[%s4460_s1 + $0x354] ss:$8 sps:$4 sm:$0xff]  }
  0xbd   :  { %1906 = vmatprep.subr.bf16.mxu0 %v3248_v19  ;;  %v3278_v49 = vld [vmem:[%s4460_s1 + $0x740] ss:$8 sps:$4 sm:$0xff]   ;;  %v3286_v51 = vld [vmem:[%s4460_s1 + $0x754] ss:$8 sps:$4 sm:$0xff]   ;;  %v3281_v52 = vld [vmem:[%s4460_s1 + $0x350] ss:$8 sps:$4 sm:$0xff]  }
  0xbe   :  { %v3284_v53 = vld [vmem:[%s4460_s1 + $0x750] ss:$8 sps:$4 sm:$0xff]   ;;  %v3289_v54 = vld [vmem:[%s4460_s1 + $0x364] ss:$8 sps:$4 sm:$0xff]   ;;  %v3287_v56 = vld [vmem:[%s4460_s1 + $0x360] ss:$8 sps:$4 sm:$0xff]  }
  0xbf   :  { %1743 = vmatpush1.bf16.msra.mxu1 %v3243_v23  ;;  %v3292_v55 = vld [vmem:[%s4460_s1 + $0x764] ss:$8 sps:$4 sm:$0xff]   ;;  %v3290_v57 = vld [vmem:[%s4460_s1 + $0x760] ss:$8 sps:$4 sm:$0xff]   ;;  %v3295_v58 = vld [vmem:[%s4460_s1 + $0x374] ss:$8 sps:$4 sm:$0xff]  }
  0xc0   :  { %1907 = vmatpush1.bf16.msra.mxu0 %v3246_v25  ;;  %1753 = vmatprep.subr.bf16.mxu1 %v3252_v26  ;;  %v3298_v59 = vld [vmem:[%s4460_s1 + $0x774] ss:$8 sps:$4 sm:$0xff]   ;;  %v3293_v60 = vld [vmem:[%s4460_s1 + $0x370] ss:$8 sps:$4 sm:$0xff]   ;;  %v3301_v62 = vld [vmem:[%s4460_s1 + $0x384] ss:$8 sps:$4 sm:$0xff]  }
  0xc1   :  { %1917 = vmatprep.subr.bf16.mxu0 %v3256_v27  ;;  %v3296_v61 = vld [vmem:[%s4460_s1 + $0x770] ss:$8 sps:$4 sm:$0xff]   ;;  %v3304_v63 = vld [vmem:[%s4460_s1 + $0x784] ss:$8 sps:$4 sm:$0xff]   ;;  %v3299_v0 = vld [vmem:[%s4460_s1 + $0x380] ss:$8 sps:$4 sm:$0xff]  }
  0xc2   :  { %1745 = vmatmul.mubr.bf16.vlgmr.msra.gmra.mrb[0].mxu1 %v70_v30  ;;  %v3302_v1 = vld [vmem:[%s4460_s1 + $0x780] ss:$8 sps:$4 sm:$0xff]   ;;  %v3307_v2 = vld [vmem:[%s4460_s1 + $0x394] ss:$8 sps:$4 sm:$0xff]   ;;  %v3305_v4 = vld [vmem:[%s4460_s1 + $0x390] ss:$8 sps:$4 sm:$0xff]  }
  0xc3   :  { %1909 = vmatmul.mubr.bf16.vlgmr.msra.gmra.mrb[0].mxu0 %v78_v31  ;;  %1754 = vmatpush1.bf16.msra.mxu1 %v3250_v32  ;;  %v3310_v3 = vld [vmem:[%s4460_s1 + $0x794] ss:$8 sps:$4 sm:$0xff]   ;;  %v3308_v5 = vld [vmem:[%s4460_s1 + $0x790] ss:$8 sps:$4 sm:$0xff]   ;;  %v3313_v6 = vld [vmem:[%s4460_s1 + $0x3a4] ss:$8 sps:$4 sm:$0xff]  }
  0xc4   :  { %1918 = vmatpush1.bf16.msra.mxu0 %v3254_v33  ;;  %1755 = vmatprep.subr.bf16.mxu1 %v3259_v34  ;;  %v3316_v7 = vld [vmem:[%s4460_s1 + $0x7a4] ss:$8 sps:$4 sm:$0xff]   ;;  %v3311_v8 = vld [vmem:[%s4460_s1 + $0x3a0] ss:$8 sps:$4 sm:$0xff]   ;;  %v3319_v10 = vld [vmem:[%s4460_s1 + $0x3b4] ss:$8 sps:$4 sm:$0xff]   ;;  %v72_v34 = vpack.c.bf16 %v4096_v20, %v4096_v20 }
  0xc5   :  { %1919 = vmatprep.subr.bf16.mxu0 %v3262_v22  ;;  %1785 = vmatprep.mubr.bf16.mxu1 %v73_v24  ;;  %v3314_v9 = vld [vmem:[%s4460_s1 + $0x7a0] ss:$8 sps:$4 sm:$0xff]   ;;  %v3322_v11 = vld [vmem:[%s4460_s1 + $0x7b4] ss:$8 sps:$4 sm:$0xff]   ;;  %v3317_v12 = vld [vmem:[%s4460_s1 + $0x3b0] ss:$8 sps:$4 sm:$0xff]   ;;  %v80_v22 = vpack.c.bf16 %v4101_v21, %v4101_v21 }
  0xc6   :  { %1949 = vmatprep.mubr.bf16.mxu0 %v81_v35  ;;  %v3320_v13 = vld [vmem:[%s4460_s1 + $0x7b0] ss:$8 sps:$4 sm:$0xff]   ;;  %v3325_v14 = vld [vmem:[%s4460_s1 + $0x3c4] ss:$8 sps:$4 sm:$0xff]   ;;  %v3323_v16 = vld [vmem:[%s4460_s1 + $0x3c0] ss:$8 sps:$4 sm:$0xff]  }
  0xc7   :  { %1756 = vmatpush1.bf16.msra.mxu1 %v3257_v36  ;;  %v3328_v15 = vld [vmem:[%s4460_s1 + $0x7c4] ss:$8 sps:$4 sm:$0xff]   ;;  %v3326_v17 = vld [vmem:[%s4460_s1 + $0x7c0] ss:$8 sps:$4 sm:$0xff]   ;;  %v3331_v18 = vld [vmem:[%s4460_s1 + $0x3d4] ss:$8 sps:$4 sm:$0xff]  }
  0xc8   :  { %1920 = vmatpush1.bf16.msra.mxu0 %v3260_v37  ;;  %1757 = vmatprep.subr.bf16.mxu1 %v3265_v38  ;;  %v3334_v19 = vld [vmem:[%s4460_s1 + $0x7d4] ss:$8 sps:$4 sm:$0xff]   ;;  %v3329_v23 = vld [vmem:[%s4460_s1 + $0x3d0] ss:$8 sps:$4 sm:$0xff]   ;;  %v3337_v26 = vld [vmem:[%s4460_s1 + $0x3e4] ss:$8 sps:$4 sm:$0xff]   ;;  %v340_v37 = vlaneseq }
  0xc9   :  { %1921 = vmatprep.subr.bf16.mxu0 %v3268_v39  ;;  %v3332_v25 = vld [vmem:[%s4460_s1 + $0x7d0] ss:$8 sps:$4 sm:$0xff]   ;;  %v3340_v27 = vld [vmem:[%s4460_s1 + $0x7e4] ss:$8 sps:$4 sm:$0xff]   ;;  %v3335_v28 = vld [vmem:[%s4460_s1 + $0x3e0] ss:$8 sps:$4 sm:$0xff]  }
  0xca   :  { %v3338_v29 = vld [vmem:[%s4460_s1 + $0x7e0] ss:$8 sps:$4 sm:$0xff]   ;;  %v3343_v30 = vld [vmem:[%s4460_s1 + $0x3f4] ss:$8 sps:$4 sm:$0xff]   ;;  %v3341_v32 = vld [vmem:[%s4460_s1 + $0x3f0] ss:$8 sps:$4 sm:$0xff]  }
  0xcb   :  { %1758 = vmatpush1.bf16.msra.mxu1 %v3263_v40  ;;  %v3346_v31 = vld [vmem:[%s4460_s1 + $0x7f4] ss:$8 sps:$4 sm:$0xff]   ;;  %v3344_v33 = vld [vmem:[%s4460_s1 + $0x7f0] ss:$8 sps:$4 sm:$0xff]   ;;  %v3429_v24 = vmov 0.0   ;;  %v3349_v35 = vld [vmem:[%s4462_s3] sm:$0xff]  }
  0xcc   :  { %1922 = vmatpush1.bf16.msra.mxu0 %v3266_v41  ;;  %1759 = vmatprep.subr.bf16.mxu1 %v3271_v42  ;;  %v3350_v20 = vld [vmem:[%s4464_s5] sm:$0xff]   ;;  %v3351_v21 = vld [vmem:[%s4462_s3 + $0x8] sm:$0xff]   ;;  %v341_v38 = vshrl.u32 %v340_v37, 7  ;;  %v3431_v41 = vmov 1983009808   ;;  %vm2113_vm2 = vcmask 1041409  }
  0xcd   :  { %1923 = vmatprep.subr.bf16.mxu0 %v3274_v43  ;;  %v3352_v36 = vld [vmem:[%s4464_s5 + $0x8] sm:$0xff]   ;;  %v338_v40 = vld [vmem:[%s4461_s2] sm:$0x3]  ;;  %v1960_v42 = vunpack.c.l.s4 %v3431_v41  ;;  %s3432_s2 = smov 32   ;;  %s3433_s5 = smov 64   ;;  %vm2250_vm3 = vcmask 1043459  }
  0xce   :  { %v4335_v39 = vsub.s32 0, %v341_v38  ;;  %v4340_v43 = vsub.s32 1, %v341_v38  ;;  %vm2253_vm4 = vcmask 1041408  }
  0xcf   :  { %1760 = vmatpush1.bf16.msra.mxu1 %v3269_v44 }
  0xd0   :  { %1924 = vmatpush1.bf16.msra.mxu0 %v3272_v45  ;;  %1761 = vmatprep.subr.bf16.mxu1 %v3277_v46  ;;  %v343_v44 = vrot.slane %v338_v40, %v4335_v39  ;;  %v1961_v45 = vunpack.c.0.s8 %v1960_v42  ;;  %v347_v46 = vrot.slane %v338_v40, %v4340_v43 }
  0xd1   :  { %1925 = vmatprep.subr.bf16.mxu0 %v3280_v47 }
  0xd3   :  { %1762 = vmatpush1.bf16.msra.mxu1 %v3275_v48 }
  0xd4   :  { %1926 = vmatpush1.bf16.msra.mxu0 %v3278_v49  ;;  %1763 = vmatprep.subr.bf16.mxu1 %v3283_v50 }
  0xd5   :  { %1927 = vmatprep.subr.bf16.mxu0 %v3286_v51 }
  0xd7   :  { %1764 = vmatpush1.bf16.msra.mxu1 %v3281_v52  ;;  %v4344_v52 = vsub.s32 %v1961_v45, %v341_v38 }
  0xd8   :  { %1928 = vmatpush1.bf16.msra.mxu0 %v3284_v53  ;;  %1765 = vmatprep.subr.bf16.mxu1 %v3289_v54 }
  0xd9   :  { %1929 = vmatprep.subr.bf16.mxu0 %v3292_v55 }
  0xdb   :  { %1766 = vmatpush1.bf16.msra.mxu1 %v3287_v56 }
  0xdc   :  { %1930 = vmatpush1.bf16.msra.mxu0 %v3290_v57  ;;  %1767 = vmatprep.subr.bf16.mxu1 %v3295_v58 }
  0xdd   :  { %1931 = vmatprep.subr.bf16.mxu0 %v3298_v59 }
  0xdf   :  { %1768 = vmatpush1.bf16.msra.mxu1 %v3293_v60 }
  0xe0   :  { %1932 = vmatpush1.bf16.msra.mxu0 %v3296_v61  ;;  %1769 = vmatprep.subr.bf16.mxu1 %v3301_v62 }
  0xe1   :  { %1933 = vmatprep.subr.bf16.mxu0 %v3304_v63 }
  0xe3   :  { %1770 = vmatpush1.bf16.msra.mxu1 %v3299_v0 }
  0xe4   :  { %1934 = vmatpush1.bf16.msra.mxu0 %v3302_v1  ;;  %1771 = vmatprep.subr.bf16.mxu1 %v3307_v2 }
  0xe5   :  { %1935 = vmatprep.subr.bf16.mxu0 %v3310_v3 }
  0xe7   :  { %1772 = vmatpush1.bf16.msra.mxu1 %v3305_v4 }
  0xe8   :  { %1936 = vmatpush1.bf16.msra.mxu0 %v3308_v5  ;;  %1773 = vmatprep.subr.bf16.mxu1 %v3313_v6 }
  0xe9   :  { %1937 = vmatprep.subr.bf16.mxu0 %v3316_v7 }
  0xeb   :  { %1774 = vmatpush1.bf16.msra.mxu1 %v3311_v8 }
  0xec   :  { %1938 = vmatpush1.bf16.msra.mxu0 %v3314_v9  ;;  %1775 = vmatprep.subr.bf16.mxu1 %v3319_v10 }
  0xed   :  { %1939 = vmatprep.subr.bf16.mxu0 %v3322_v11 }
  0xef   :  { %1776 = vmatpush1.bf16.msra.mxu1 %v3317_v12 }
  0xf0   :  { %1940 = vmatpush1.bf16.msra.mxu0 %v3320_v13  ;;  %1777 = vmatprep.subr.bf16.mxu1 %v3325_v14 }
  0xf1   :  { %1941 = vmatprep.subr.bf16.mxu0 %v3328_v15 }
  0xf3   :  { %1778 = vmatpush1.bf16.msra.mxu1 %v3323_v16 }
  0xf4   :  { %1942 = vmatpush1.bf16.msra.mxu0 %v3326_v17  ;;  %1779 = vmatprep.subr.bf16.mxu1 %v3331_v18 }
  0xf5   :  { %1943 = vmatprep.subr.bf16.mxu0 %v3334_v19 }
  0xf7   :  { %1780 = vmatpush1.bf16.msra.mxu1 %v3329_v23 }
  0xf8   :  { %1944 = vmatpush1.bf16.msra.mxu0 %v3332_v25  ;;  %1781 = vmatprep.subr.bf16.mxu1 %v3337_v26 }
  0xf9   :  { %1945 = vmatprep.subr.bf16.mxu0 %v3340_v27 }
  0xfb   :  { %1782 = vmatpush1.bf16.msra.mxu1 %v3335_v28 }
  0xfc   :  { %1946 = vmatpush1.bf16.msra.mxu0 %v3338_v29  ;;  %1783 = vmatprep.subr.bf16.mxu1 %v3343_v30 }
  0xfd   :  { %1947 = vmatprep.subr.bf16.mxu0 %v3346_v31 }
  0xff   :  { %1784 = vmatpush1.bf16.msra.mxu1 %v3341_v32 }
 0x100   :  { %1948 = vmatpush1.bf16.msra.mxu0 %v3344_v33  ;;  %2899 = vmatprep.subr.bf16.mxu1 %v3429_v24 }
 0x101   :  { %2875 = vmatprep.subr.bf16.mxu0 %v3429_v24 }
 0x102   :  { %1786 = vmatmul.mubr.bf16.vlgmr.msra.gmra.mrb[0].mxu1 %v72_v34 }
 0x103   :  { %1950 = vmatmul.mubr.bf16.vlgmr.msra.gmra.mrb[0].mxu0 %v80_v22  ;;  %2900 = vmatpush3.bf16.msra.mxu1 %v3350_v20 }
 0x104   :  { %2876 = vmatpush3.bf16.msra.mxu0 %v3349_v35  ;;  %2901 = vmatprep.subr.bf16.mxu1 %v3429_v24 }
 0x105   :  { %2877 = vmatprep.subr.bf16.mxu0 %v3429_v24  ;;  %2879 = vmatprep.mubr.msk.bf16.mxu0 %vm3430_vm0, %v3429_v24 }
 0x106   :  { %2903 = vmatprep.mubr.msk.bf16.mxu1 %vm3430_vm0, %v3429_v24 }
 0x107   :  { %2902 = vmatpush3.bf16.msra.mxu1 %v3352_v36 }
 0x108   :  { %2878 = vmatpush3.bf16.msra.mxu0 %v3351_v21  ;;  %2907 = vmatprep.subr.bf16.mxu1 %v3429_v24 }
 0x109   :  { %2883 = vmatprep.subr.bf16.mxu0 %v3429_v24 }
 0x1d5   :  { %v1787_v47 = vpop.f32.mrb[0].mxu1 }
 0x1d6   :  { %v1951_v48 = vpop.f32.mrb[0].mxu0  ;;  %v2923_v49 = vadd.f32 %v1787_v47, %v343_v44  ;;  %v1789_v50 = vpop.f32.mrb[1].mxu1 }
 0x1d7   :  { %v1953_v51 = vpop.f32.mrb[1].mxu0  ;;  %v2925_v53 = vadd.f32 %v1789_v50, %v347_v46  ;;  %v1791_v54 = vpop.f32.mrb[2].mxu1 }
 0x1d8   :  { %v1955_v55 = vpop.f32.mrb[2].mxu0  ;;  %v2924_v56 = vadd.f32 %v2923_v49, %v1951_v48  ;;  %v1792_v57 = vpop.f32.mrb[3].mxu1 }
 0x1d9   :  { %v1956_v58 = vpop.f32.mrb[3].mxu0  ;;  %v4346_v59 = vadd.f32 %v2925_v53, %v1953_v51 }
 0x1da   :  { %v4365_v0 = vrot.slane %v2924_v56, %v4344_v52 }
 0x1db   :  { %v1973_v60 = vpack.c.bf16 %v4346_v59, %v4346_v59  ;;  %v2064_v61 = vrot.slane %v4346_v59, %v4344_v52 }
 0x1dc   :  { %v4372_v6 = vcombine.high %v4365_v0, %v4365_v0 }
 0x1dd   :  { %v2330_v62 = vrot.slane %v1973_v60, 1  ;;  %2880 = vmatmul.mubr.msk.bf16.vlgmr.msra.gmra.mrb[4].mxu0 %vm1986_vm1, %v1973_v60  ;;  %v2065_v63 = vrot.slane %v2064_v61, 1 }
 0x1de   :  { %2884 = vmatpush3.bf16.msra.mxu0 %v3349_v35  ;;  %2887 = vmatprep.mubr.msk.bf16.mxu0 %vm3430_vm0, %v3429_v24 }
 0x1df   :  { %2068 = vrot.lane.b32.xlu1 %v2065_v63, %s3432_s2  ;;  %2904 = vmatmul.mubr.msk.bf16.vlgmr.msra.gmra.mrb[4].mxu1 %vm1986_vm1, %v2330_v62 }
 0x1e0   :  { %2885 = vmatprep.subr.bf16.mxu0 %v3429_v24  ;;  %2908 = vmatpush3.bf16.msra.mxu1 %v3350_v20 }
 0x1e1   :  { %2909 = vmatprep.subr.bf16.mxu1 %v3429_v24  ;;  %2911 = vmatprep.mubr.msk.bf16.mxu1 %vm3430_vm0, %v3429_v24 }
 0x1e2   :  { %2886 = vmatpush3.bf16.msra.mxu0 %v3351_v21 }
 0x1e3   :  { %2066 = vrot.lane.b32.xlu1 %v2064_v61, %s3432_s2  ;;  %2891 = vmatprep.subr.bf16.mxu0 %v3429_v24 }
 0x1e4   :  { %2910 = vmatpush3.bf16.msra.mxu1 %v3352_v36 }
 0x1e5   :  { %2915 = vmatprep.subr.bf16.mxu1 %v3429_v24 }
 0x251   :  { %v2069_v32 = vpop.permute.xlu1 %2068 }
 0x255   :  { %v2067_v34 = vpop.permute.xlu1 %2066 }
 0x2b0   :  { %v2024_v1 = vpop.f32.mrb[4].mxu0 }
 0x2b1   :  { %v2037_v2 = vrot.slane %v2024_v1, %v4344_v52  ;;  %v2881_v3 = vpop.f32.mrb[5].mxu0 }
 0x2b2   :  { %v2027_v4 = vpop.f32.mrb[6].mxu0  ;;  %v4368_v5 = vpop.f32.mrb[4].mxu1 }
 0x2b3   :  { %v2038_v7 = vrot.slane %v2037_v2, 1  ;;  %v2882_v8 = vpop.f32.mrb[7].mxu0  ;;  %v2905_v9 = vpop.f32.mrb[5].mxu1  ;;  %v2041_v13 = vadd.f32 %v2037_v2, %v4365_v0 }
 0x2b4   :  { %v2383_v10 = vpop.f32.mrb[6].mxu1 }
 0x2b5   :  { %v2042_v11 = vadd.f32 %v2038_v7, %v4372_v6  ;;  %v2906_v12 = vpop.f32.mrb[7].mxu1  ;;  %v2838_v17 = vmul.f32 -1.442695, %v2041_v13 }
 0x2b7   :  { %3357 = vtanh.f32 %v2042_v11  ;;  %v2839_v16 = vmul.f32 -1.442695, %v2042_v11 }
 0x2b8   :  { %3359 = vtanh.f32 %v2041_v13 }
 0x2b9   :  { %3361 = vpow2.f32 %v2839_v16 }
 0x2ba   :  { %3363 = vpow2.f32 %v2838_v17 }
 0x2c1   :  { %v3358_v14 = vpop.eup %3357 }
 0x2c2   :  { %2078 = vrot.lane.b32.xlu0 %v3358_v14, %s3433_s5  ;;  %v3360_v15 = vpop.eup %3359 }
 0x2c3   :  { %v3362_v18 = vpop.eup %3361 }
 0x2c4   :  { %v2050_v19 = vadd.f32 1.0, %v3362_v18  ;;  %v3364_v23 = vpop.eup %3363 }
 0x2c5   :  { %v2049_v25 = vadd.f32 1.0, %v3364_v23 }
 0x2c6   :  { %2076 = vrot.lane.b32.xlu0 %v3360_v15, %s3433_s5  ;;  %3365 = vrcp.f32 %v2050_v19 }
 0x2c7   :  { %3367 = vrcp.f32 %v2049_v25 }
 0x2d0   :  { %v3366_v26 = vpop.eup %3365 }
 0x2d1   :  { %v3368_v29 = vpop.eup %3367  ;;  %v2073_v33 = vmul.f32 %v3366_v26, %v2069_v32 }
 0x2d2   :  { %v2072_v20 = vmul.f32 %v3368_v29, %v2067_v34 }
 0x334   :  { %v2079_v27 = vpop.permute.xlu0 %2078 }
 0x335   :  { %v2083_v28 = vmul.f32 %v3366_v26, %v2079_v27 }
 0x337   :  { %2088 = vrot.lane.b32.xlu0 %v2083_v28, %s3432_s2 }
 0x338   :  { %v2077_v30 = vpop.permute.xlu0 %2076 }
 0x339   :  { %v2082_v31 = vmul.f32 %v3368_v29, %v2077_v30  ;;  %v3354_v30 = vld [vmem:[%s4463_s4 + $0x8] sm:$0xff]  }
 0x33b   :  { %2086 = vrot.lane.b32.xlu1 %v2082_v31, %s3432_s2 }
 0x3a9   :  { %v2089_v22 = vpop.permute.xlu0 %2088 }
 0x3aa   :  { %v4380_v35 = vadd.f32 %v2089_v22, %v2073_v33 }
 0x3ac   :  { %3369 = vtanh.f32 %v4380_v35  ;;  %v2191_v15 = vrot.slane %v4380_v35, 7 }
 0x3ad   :  { %v2087_v21 = vpop.permute.xlu1 %2086 }
 0x3ae   :  { %v4383_v36 = vadd.f32 %v2087_v21, %v2072_v20 }
 0x3b0   :  { %3371 = vtanh.f32 %v4383_v36  ;;  %v2190_v17 = vrot.slane %v4383_v36, 7 }
 0x3b6   :  { %v3370_v37 = vpop.eup %3369 }
 0x3b7   :  { %2100 = vrot.lane.b32.xlu0 %v3370_v37, %s3433_s5  ;;  %v2394_v37 = vrot.slane %v4346_v59, 2 }
 0x3ba   :  { %v3372_v38 = vpop.eup %3371 }
 0x3bb   :  { %2098 = vrot.lane.b32.xlu1 %v3372_v38, %s3433_s5 }
 0x429   :  { %v2101_v40 = vpop.permute.xlu0 %2100 }
 0x42a   :  { %v2105_v41 = vmul.f32 %v3366_v26, %v2101_v40  ;;  %v2843_v40 = vld [vmem:[%s4465_s6] ss:$0 sm:$0xff] }
 0x42c   :  { %v2107_v42 = vpack.c.bf16 %v2105_v41, %v2105_v41  ;;  %v2237_v47 = vrot.slane %v2105_v41, %v4335_v39 }
 0x42d   :  { %v2099_v44 = vpop.permute.xlu1 %2098 }
 0x42e   :  { %v2111_v45 = vunpack.c.l.b16 %v2107_v42  ;;  %v2104_v46 = vmul.f32 %v3368_v29, %v2099_v44  ;;  %v3353_v29 = vld [vmem:[%s4463_s4] sm:$0xff]  }
 0x430   :  { %v2106_v48 = vpack.c.bf16 %v2104_v46, %v2104_v46  ;;  %v2233_v49 = vrot.slane %v2104_v46, %v4335_v39  ;;  %v2112_v50 = vrot.slane %v2111_v45, 7 }
 0x432   :  { %v2110_v51 = vunpack.c.l.b16 %v2106_v48  ;;  %v4390_v53 = vsel %vm2113_vm2, %v2237_v47, %v2233_v49 }
 0x434   :  { %v2114_v54 = vsel %vm2113_vm2, %v2112_v50, %v2110_v51 }
 0x435   :  { %v2115_v55 = vpack.c.b16 %v2114_v54, %v2114_v54 }
 0x437   :  { %2116 = vrot.lane.b32.xlu0 %v2115_v55, %s3432_s2 }
 0x4a9   :  { %v2117_v56 = vpop.permute.xlu0 %2116 }
 0x4aa   :  { %2888 = vmatmul.mubr.msk.bf16.vlgmr.msra.gmra.mrb[8].mxu0 %vm1986_vm1, %v2117_v56 }
 0x4ab   :  { %2895 = vmatprep.mubr.msk.bf16.mxu0 %vm3430_vm0, %v3429_v24  ;;  %2892 = vmatpush3.bf16.msra.mxu0 %v3353_v29 }
 0x4ac   :  { %2893 = vmatprep.subr.bf16.mxu0 %v3429_v24 }
 0x4af   :  { %2894 = vmatpush3.bf16.msra.mxu0 %v3354_v30 }
 0x57d   :  { %v2155_v57 = vpop.f32.mrb[8].mxu0 }
 0x57e   :  { %v2168_v58 = vrot.slane %v2155_v57, %v4344_v52  ;;  %v2889_v60 = vpop.f32.mrb[9].mxu0 }
 0x57f   :  { %v2158_v61 = vpop.f32.mrb[10].mxu0 }
 0x580   :  { %v2169_v39 = vrot.slane %v2168_v58, 7  ;;  %v2173_v62 = vadd.f32 %v2168_v58, %v4372_v6  ;;  %v2890_v63 = vpop.f32.mrb[11].mxu0 }
 0x582   :  { %v2172_v1 = vadd.f32 %v2169_v39, %v4365_v0  ;;  %3373 = vtanh.f32 %v2173_v62  ;;  %v2842_v4 = vmul.f32 -1.442695, %v2173_v62 }
 0x584   :  { %3375 = vtanh.f32 %v2172_v1  ;;  %v2841_v7 = vmul.f32 -1.442695, %v2172_v1 }
 0x585   :  { %3377 = vpow2.f32 %v2842_v4 }
 0x586   :  { %3379 = vpow2.f32 %v2841_v7 }
 0x58c   :  { %v3374_v2 = vpop.eup %3373 }
 0x58d   :  { %2200 = vrot.lane.b32.xlu0 %v3374_v2, %s3433_s5 }
 0x58e   :  { %v3376_v3 = vpop.eup %3375 }
 0x58f   :  { %2198 = vrot.lane.b32.xlu1 %v3376_v3, %s3433_s5  ;;  %v3378_v52 = vpop.eup %3377 }
 0x590   :  { %v3380_v8 = vpop.eup %3379  ;;  %v2181_v9 = vadd.f32 1.0, %v3378_v52 }
 0x591   :  { %v2180_v10 = vadd.f32 1.0, %v3380_v8 }
 0x592   :  { %3381 = vrcp.f32 %v2181_v9 }
 0x593   :  { %3383 = vrcp.f32 %v2180_v10 }
 0x59c   :  { %v3382_v6 = vpop.eup %3381 }
 0x59d   :  { %v3384_v12 = vpop.eup %3383  ;;  %v2195_v16 = vmul.f32 %v3382_v6, %v2191_v15  ;;  %v3355_v15 = vld [vmem:[%s4466_s7] sm:$0xff]  }
 0x59e   :  { %v2194_v23 = vmul.f32 %v3384_v12, %v2190_v17 }
 0x5ff   :  { %v2201_v0 = vpop.permute.xlu0 %2200 }
 0x600   :  { %v2205_v11 = vmul.f32 %v3382_v6, %v2201_v0 }
 0x601   :  { %v2199_v13 = vpop.permute.xlu1 %2198 }
 0x602   :  { %2210 = vrot.lane.b32.xlu0 %v2205_v11, %s3432_s2  ;;  %v2204_v14 = vmul.f32 %v3384_v12, %v2199_v13 }
 0x604   :  { %2208 = vrot.lane.b32.xlu1 %v2204_v14, %s3432_s2 }
 0x674   :  { %v2211_v18 = vpop.permute.xlu0 %2210 }
 0x675   :  { %v2215_v19 = vadd.f32 %v2211_v18, %v2195_v16  ;;  %v3356_v16 = vld [vmem:[%s4466_s7 + $0x8] sm:$0xff]   ;;  %s3434_s7 = smov [#allocation2]  }
 0x676   :  { %v2209_v25 = vpop.permute.xlu1 %2208  ;;  %s2571_s23 = sshll.u32 %s3434_s7, 4  ;;  %s2572_s23 = int_to_ptr.vmem [resolvable:$true] %s2571_s23 }
 0x677   :  { %3385 = vtanh.f32 %v2215_v19  ;;  %v2214_v26 = vadd.f32 %v2209_v25, %v2194_v23  ;;  %s3405_s24 = scalar_lea.vmem %s2572_s23, 32  ;;  %p3410_p1 = scmp.lt.s32.totalorder %s2572_s23, %s2572_s23 }
 0x678   :  { %p3406_p0 = scmp.ne.s32.totalorder %s2572_s23, %s3405_s24  ;;  %p3411_p2 = scmp.lt.s32.totalorder %s3405_s24, %s3405_s24 }
 0x679   :  { %3387 = vtanh.f32 %v2214_v26 }
 0x67a   :  { %p3412_p3 = por %p3411_p2, %p3410_p1 }
 0x67c   :  { %p3413_p4 = pnand %p3412_p3, %p3406_p0 }
 0x681   :  { %v3386_v27 = vpop.eup %3385 }
 0x682   :  { %2222 = vrot.lane.b32.xlu0 %v3386_v27, %s3433_s5  ;;  %v2853_v27 = vld [vmem:[%s4467_s8] ss:$0 sm:$0xff] }
 0x683   :  { %v3388_v28 = vpop.eup %3387 }
 0x684   :  { %2220 = vrot.lane.b32.xlu1 %v3388_v28, %s3433_s5 }
 0x6f4   :  { %v2223_v31 = vpop.permute.xlu0 %2222 }
 0x6f5   :  { %v2227_v32 = vmul.f32 %v3382_v6, %v2223_v31 }
 0x6f6   :  { %v2221_v33 = vpop.permute.xlu1 %2220 }
 0x6f7   :  { %v2226_v34 = vmul.f32 %v3384_v12, %v2221_v33  ;;  %v2249_v22 = vrot.slane %v2227_v32, %v4340_v43 }
 0x6f9   :  { %v2245_v35 = vrot.slane %v2226_v34, %v4340_v43 }
 0x6fb   :  { %v2251_v20 = vsel %vm2250_vm3, %v2249_v22, %v2245_v35 }
 0x6fc   :  { %v2254_v21 = vsel %vm2253_vm4, %v4390_v53, %v2251_v20 }
 0x6fd   :  { %v2255_v36 = vpack.c.bf16 %v2254_v21, %v2254_v21 }
 0x6ff   :  { %2268 = vrot.lane.b32.xlu1 %v2255_v36, %s3432_s2 }
 0x703   :  { %2395 = vrot.lane.b32.xlu1 %v2394_v37, %s3432_s2 }
 0x771   :  { %v2269_v38 = vpop.permute.xlu1 %2268 }
 0x772   :  { %2896 = vmatmul.mubr.msk.bf16.vlgmr.msra.gmra.mrb[12].mxu0 %vm1986_vm1, %v2269_v38 }
 0x775   :  { %v2396_v54 = vpop.permute.xlu1 %2395 }
 0x845   :  { %v2319_v41 = vpop.f32.mrb[12].mxu0 }
 0x846   :  { %v2320_v43 = vadd.f32 %v2843_v40, %v2319_v41  ;;  %v2897_v42 = vpop.f32.mrb[13].mxu0 }
 0x847   :  { %v2322_v44 = vpop.f32.mrb[14].mxu0 }
 0x848   :  { %v2386_v45 = vadd.f32 %v4368_v5, %v2320_v43  ;;  %v2898_v46 = vpop.f32.mrb[15].mxu0 }
 0x84a   :  { %3389 = vtanh.f32 %v2386_v45  ;;  %v2850_v59 = vmul.f32 -1.442695, %v2386_v45 }
 0x84c   :  { %3391 = vpow2.f32 %v2850_v59 }
 0x854   :  { %v3390_v47 = vpop.eup %3389 }
 0x855   :  { %2400 = vrot.lane.b32.xlu0 %v3390_v47, %s3433_s5 }
 0x856   :  { %v3392_v48 = vpop.eup %3391 }
 0x857   :  { %v2390_v49 = vadd.f32 1.0, %v3392_v48 }
 0x859   :  { %3393 = vrcp.f32 %v2390_v49 }
 0x863   :  { %v3394_v50 = vpop.eup %3393 }
 0x864   :  { %v2398_v55 = vmul.f32 %v3394_v50, %v2396_v54 }
 0x8c7   :  { %v2401_v51 = vpop.permute.xlu0 %2400 }
 0x8c8   :  { %v2403_v53 = vmul.f32 %v3394_v50, %v2401_v51 }
 0x8ca   :  { %2405 = vrot.lane.b32.xlu0 %v2403_v53, %s3432_s2 }
 0x93c   :  { %v2406_v56 = vpop.permute.xlu0 %2405 }
 0x93d   :  { %v2408_v57 = vadd.f32 %v2406_v56, %v2398_v55 }
 0x93f   :  { %3395 = vtanh.f32 %v2408_v57  ;;  %v2474_v11 = vrot.slane %v2408_v57, 6 }
 0x949   :  { %v3396_v5 = vpop.eup %3395 }
 0x94a   :  { %2411 = vrot.lane.b32.xlu1 %v3396_v5, %s3433_s5 }
 0x9bc   :  { %v2412_v58 = vpop.permute.xlu1 %2411 }
 0x9bd   :  { %v2414_v60 = vmul.f32 %v3394_v50, %v2412_v58 }
 0x9bf   :  { %v2415_v61 = vpack.c.bf16 %v2414_v60, %v2414_v60 }
 0x9c1   :  { %2417 = vrot.lane.b32.xlu0 %v2415_v61, %s3432_s2 }
 0xa33   :  { %v2418_v39 = vpop.permute.xlu0 %2417 }
 0xa34   :  { %2912 = vmatmul.mubr.msk.bf16.vlgmr.msra.gmra.mrb[8].mxu1 %vm1986_vm1, %v2418_v39 }
 0xa35   :  { %2919 = vmatprep.mubr.msk.bf16.mxu1 %vm3430_vm0, %v3429_v24  ;;  %2916 = vmatpush3.bf16.msra.mxu1 %v3355_v15 }
 0xa36   :  { %2917 = vmatprep.subr.bf16.mxu1 %v3429_v24 }
 0xa39   :  { %2918 = vmatpush3.bf16.msra.mxu1 %v3356_v16 }
 0xb07   :  { %v2456_v62 = vpop.f32.mrb[8].mxu1 }
 0xb08   :  { %v2463_v63 = vrot.slane %v2456_v62, 6  ;;  %v2913_v1 = vpop.f32.mrb[9].mxu1 }
 0xb09   :  { %v2459_v2 = vpop.f32.mrb[10].mxu1 }
 0xb0a   :  { %v2465_v3 = vadd.f32 %v2463_v63, %v2320_v43  ;;  %v2914_v4 = vpop.f32.mrb[11].mxu1 }
 0xb0c   :  { %3397 = vtanh.f32 %v2465_v3  ;;  %v2852_v52 = vmul.f32 -1.442695, %v2465_v3 }
 0xb0e   :  { %3399 = vpow2.f32 %v2852_v52 }
 0xb16   :  { %v3398_v7 = vpop.eup %3397 }
 0xb17   :  { %2478 = vrot.lane.b32.xlu1 %v3398_v7, %s3433_s5 }
 0xb18   :  { %v3400_v8 = vpop.eup %3399 }
 0xb19   :  { %v2469_v9 = vadd.f32 1.0, %v3400_v8 }
 0xb1b   :  { %3401 = vrcp.f32 %v2469_v9 }
 0xb25   :  { %v3402_v10 = vpop.eup %3401 }
 0xb26   :  { %v2476_v12 = vmul.f32 %v3402_v10, %v2474_v11 }
 0xb89   :  { %v2479_v6 = vpop.permute.xlu1 %2478 }
 0xb8a   :  { %v2481_v0 = vmul.f32 %v3402_v10, %v2479_v6 }
 0xb8c   :  { %2483 = vrot.lane.b32.xlu0 %v2481_v0, %s3432_s2 }
 0xbfe   :  { %v2484_v13 = vpop.permute.xlu0 %2483 }
 0xbff   :  { %v2486_v14 = vadd.f32 %v2484_v13, %v2476_v12 }
 0xc01   :  { %3403 = vtanh.f32 %v2486_v14 }
 0xc0b   :  { %v3404_v17 = vpop.eup %3403 }
 0xc0c   :  { %2489 = vrot.lane.b32.xlu1 %v3404_v17, %s3433_s5 }
 0xc7e   :  { %v2490_v18 = vpop.permute.xlu1 %2489 }
 0xc7f   :  { %v2492_v19 = vmul.f32 %v3402_v10, %v2490_v18 }
 0xc81   :  { %v2493_v23 = vpack.c.bf16 %v2492_v19, %v2492_v19 }
 0xc83   :  { %v2506_v25 = vrot.slane %v2493_v23, 1 }
 0xc85   :  { %2507 = vrot.lane.b32.xlu0 %v2506_v25, %s3432_s2 }
 0xcf7   :  { %v2508_v26 = vpop.permute.xlu0 %2507 }
 0xcf8   :  { %2920 = vmatmul.mubr.msk.bf16.vlgmr.msra.gmra.mrb[12].mxu1 %vm1986_vm1, %v2508_v26 }
 0xdcb   :  { %v2558_v24 = vpop.f32.mrb[12].mxu1 }
 0xdcc   :  { %v2559_v28 = vadd.f32 %v2853_v27, %v2558_v24  ;;  %v2921_v29 = vpop.f32.mrb[13].mxu1 }
 0xdcd   :  { %v2561_v30 = vpop.f32.mrb[14].mxu1 }
 0xdce   :  { %2564 = vst [vmem:[#allocation2] sm:$0x3] %v2559_v28  ;;  %v2922_v31 = vpop.f32.mrb[15].mxu1 }
 0xdcf   :  { %3416 = shalt.err (!%p3413_p4)
}
 0xdd0   :  { %s3417_s8 = scalar_lea.hbm %s4468_s9, 32 }
 0xdd1   :  { %p3418_p5 = scmp.ne.s32.totalorder %s4468_s9, %s3417_s8  ;;  %p3421_p6 = scmp.lt.u32.totalorder %s3417_s8, %s4468_s9 }
 0xdd3   :  { %p3423_p7 = pnand %p3421_p6, %p3418_p5 }
 0xdd5   :  { %3426 = shalt.err (!%p3423_p7)
}
 0xdd6   :  { %2574 = dma.vmem_to_hbm [thread:$0]  %s2572_s23, 32, %s4468_s9, [#allocation3]  }
 0xdd7   :  { %3427 = dma.done.wait [#allocation3], 32  }
 0xdd8   :  { %3428 = vsyncadd [#allocation3], 4294967264 }
 0xdd9   :  { %2578 = vsyncpa [#allocation3], 1 }

</bundles_post_ra>
